<compile_context>
chip_gen: v7x
topology: tpu7x:2x2x1
jax: 0.10.0
libtpu: 0.0.40
codegen_flags: <defaults>
</compile_context>

<pallas_src>
import functools

import jax
import jax.numpy as jnp
from jax import lax
from jax.experimental import pallas as pl
from jax.experimental.pallas import tpu as pltpu


def _round_up(x, m):
    return (x + m - 1) // m * m


# ------------------------------ Pallas kernels -------------------------------

def _gemm_kernel(*refs, has_bias, negative_slope):
    """o = A @ W (+ bias) (+ LeakyReLU), accumulated over the K grid axis."""
    if has_bias:
        a_ref, w_ref, b_ref, o_ref, acc_ref = refs
    else:
        a_ref, w_ref, o_ref, acc_ref = refs
        b_ref = None

    k = pl.program_id(2)

    @pl.when(k == 0)
    def _():
        acc_ref[...] = jnp.zeros_like(acc_ref)

    acc_ref[...] += jnp.dot(a_ref[...], w_ref[...],
                            preferred_element_type=jnp.float32)

    @pl.when(k == pl.num_programs(2) - 1)
    def _():
        out = acc_ref[...]
        if b_ref is not None:
            out = out + b_ref[...]
        if negative_slope is not None:
            out = jnp.where(out > 0, out, negative_slope * out)
        o_ref[...] = out.astype(o_ref.dtype)


def _bn_stats_kernel(x_ref, sum_ref, ssq_ref, sum_acc, ssq_acc):
    """Per-column sum / sum-of-squares, accumulated over the inner M axis."""
    i = pl.program_id(1)

    @pl.when(i == 0)
    def _():
        sum_acc[...] = jnp.zeros_like(sum_acc)
        ssq_acc[...] = jnp.zeros_like(ssq_acc)

    x = x_ref[...].astype(jnp.float32)
    sum_acc[...] += jnp.sum(x, axis=0, keepdims=True)
    ssq_acc[...] += jnp.sum(x * x, axis=0, keepdims=True)

    @pl.when(i == pl.num_programs(1) - 1)
    def _():
        sum_ref[...] = sum_acc[...]
        ssq_ref[...] = ssq_acc[...]


def _bn_norm_kernel(x_ref, scale_ref, shift_ref, o_ref, *, negative_slope):
    """y = x * scale + shift, then LeakyReLU."""
    y = x_ref[...].astype(jnp.float32) * scale_ref[...] + shift_ref[...]
    y = jnp.where(y > 0, y, negative_slope * y)
    o_ref[...] = y.astype(o_ref.dtype)


# --------------------------------- wrappers ----------------------------------

def _pick_tk(k):
    if k % 128 == 0:
        for t in (512, 256, 128):
            if k % t == 0:
                return t
    return k  # full-extent K block (e.g. K=64 for the first layer)


def conv_gemm(patches, wmat, bias, *, negative_slope, out_dtype):
    """patches [M,K] @ wmat [K,Cout] (+bias) (+LeakyReLU) -> padded [Mpad,Npad].

    Output is lane-dense: Cout is padded up to a multiple of 128 and M up to a
    multiple of the row tile tm (zeros).  Returns (out_padded, tm).
    """
    m, k = patches.shape
    cout = wmat.shape[1]

    tm = min(256, _round_up(m, 8))
    m_pad = _round_up(m, tm)
    tn = 128                                   # lane-dense output columns
    n_pad = _round_up(cout, tn)
    tk = _pick_tk(k)

    a = jnp.pad(patches, ((0, m_pad - m), (0, 0))).astype(jnp.bfloat16)
    w = jnp.pad(wmat, ((0, 0), (0, n_pad - cout))).astype(jnp.bfloat16)

    in_specs = [
        pl.BlockSpec((tm, tk), lambda i, j, kk: (i, kk)),
        pl.BlockSpec((tk, tn), lambda i, j, kk: (kk, j)),
    ]
    args = [a, w]
    if bias is not None:
        b = jnp.pad(bias.astype(jnp.float32), (0, n_pad - cout)).reshape(1, n_pad)
        in_specs.append(pl.BlockSpec((1, tn), lambda i, j, kk: (0, j)))
        args.append(b)

    kernel = functools.partial(_gemm_kernel, has_bias=bias is not None,
                               negative_slope=negative_slope)
    out = pl.pallas_call(
        kernel,
        out_shape=jax.ShapeDtypeStruct((m_pad, n_pad), out_dtype),
        grid=(m_pad // tm, n_pad // tn, k // tk),
        in_specs=in_specs,
        out_specs=pl.BlockSpec((tm, tn), lambda i, j, kk: (i, j)),
        scratch_shapes=[pltpu.VMEM((tm, tn), jnp.float32)],
        compiler_params=pltpu.CompilerParams(
            dimension_semantics=("parallel", "parallel", "arbitrary")),
    )(*args)
    return out, tm


def batchnorm_lrelu(x_pad, gamma, beta, *, m_true, cout, tm,
                    eps=1e-5, negative_slope=0.2, out_dtype=jnp.bfloat16):
    """Training-mode BatchNorm2d + LeakyReLU on a padded [Mpad, Npad] slab.

    Rows >= m_true and cols >= cout are exact zeros (bias-free convs), so they
    add nothing to the sums; the mean/var divisor is the true row count m_true.
    """
    m_pad, n_pad = x_pad.shape
    tn = 128

    # Pass 1: tiled global reduction (sum, sum-of-squares) over the M axis.
    col_sum, col_ssq = pl.pallas_call(
        _bn_stats_kernel,
        out_shape=(jax.ShapeDtypeStruct((1, n_pad), jnp.float32),
                   jax.ShapeDtypeStruct((1, n_pad), jnp.float32)),
        grid=(n_pad // tn, m_pad // tm),
        in_specs=[pl.BlockSpec((tm, tn), lambda j, i: (i, j))],
        out_specs=(pl.BlockSpec((1, tn), lambda j, i: (0, j)),
                   pl.BlockSpec((1, tn), lambda j, i: (0, j))),
        scratch_shapes=[pltpu.VMEM((1, tn), jnp.float32),
                        pltpu.VMEM((1, tn), jnp.float32)],
        compiler_params=pltpu.CompilerParams(
            dimension_semantics=("parallel", "arbitrary")),
    )(x_pad)

    # Fold mean/var/gamma/beta into one scale & shift vector (tiny, plain JAX).
    g = jnp.pad(gamma.astype(jnp.float32), (0, n_pad - cout)).reshape(1, n_pad)
    b = jnp.pad(beta.astype(jnp.float32), (0, n_pad - cout)).reshape(1, n_pad)
    mean = col_sum / m_true
    var = jnp.maximum(col_ssq / m_true - mean * mean, 0.0)   # biased (PyTorch BN)
    scale = g * lax.rsqrt(var + eps)
    shift = b - mean * scale

    # Pass 2: tiled normalize + LeakyReLU.
    return pl.pallas_call(
        functools.partial(_bn_norm_kernel, negative_slope=negative_slope),
        out_shape=jax.ShapeDtypeStruct((m_pad, n_pad), out_dtype),
        grid=(m_pad // tm, n_pad // tn),
        in_specs=[pl.BlockSpec((tm, tn), lambda i, j: (i, j)),
                  pl.BlockSpec((1, tn), lambda i, j: (0, j)),
                  pl.BlockSpec((1, tn), lambda i, j: (0, j))],
        out_specs=pl.BlockSpec((tm, tn), lambda i, j: (i, j)),
        compiler_params=pltpu.CompilerParams(
            dimension_semantics=("parallel", "parallel")),
    )(x_pad, scale, shift)


# --------------------------------- JAX glue ----------------------------------

def im2col_nhwc(x, kh, kw, stride, pad):
    """x: [N,H,W,C] -> patches [N*Ho*Wo, C*kh*kw] (channel-major, then kh, kw).

    Channel-minor (NHWC) extraction: channels already sit on the lane axis, so
    no transposes are needed around the GEMM.
    """
    xp = jnp.pad(x, ((0, 0), (pad, pad), (pad, pad), (0, 0)))
    n, hp, wp, c = xp.shape
    ho = (hp - kh) // stride + 1
    wo = (wp - kw) // stride + 1
    cols = [xp[:, i:i + stride * ho:stride, j:j + stride * wo:stride, :]
            for i in range(kh) for j in range(kw)]
    p = jnp.stack(cols, axis=-1)                       # [N, Ho, Wo, C, kh*kw]
    return p.reshape(n * ho * wo, c * kh * kw), ho, wo


def make_discriminator_params(key, input_nc, ndf=64, n_layers=3):
    """Mirrors Discriminator.__init__ with norm_type='batch' (=> use_bias=False
    on inner convs).  NOTE: the reference code reuses the loop variable `n`
    after the loop, so the 4th conv keeps nf_mult unchanged."""
    cfgs = [dict(cin=input_nc, cout=ndf, stride=2, bias=True, bn=False, act=True)]
    nf_mult, nf_mult_prev = 1, 1
    n = 1
    for n in range(1, n_layers):
        nf_mult_prev, nf_mult = nf_mult, min(2 ** n, 8)
        cfgs.append(dict(cin=ndf * nf_mult_prev, cout=ndf * nf_mult,
                         stride=2, bias=False, bn=True, act=True))
    nf_mult_prev, nf_mult = nf_mult, min(2 ** n, 8)
    cfgs.append(dict(cin=ndf * nf_mult_prev, cout=ndf * nf_mult,
                     stride=1, bias=False, bn=True, act=True))
    cfgs.append(dict(cin=ndf * nf_mult, cout=1,
                     stride=1, bias=True, bn=False, act=False))

    layers = []
    for cfg in cfgs:
        key, kw_, kb_, kg_, kbe_ = jax.random.split(key, 5)
        w = 0.02 * jax.random.normal(kw_, (cfg["cout"], cfg["cin"], 4, 4),
                                     jnp.float32)
        b = (0.01 * jax.random.normal(kb_, (cfg["cout"],), jnp.float32)
             if cfg["bias"] else None)
        gamma = (1.0 + 0.1 * jax.random.normal(kg_, (cfg["cout"],), jnp.float32)
                 if cfg["bn"] else None)
        beta = (0.1 * jax.random.normal(kbe_, (cfg["cout"],), jnp.float32)
                if cfg["bn"] else None)
        layers.append(dict(cfg, w=w, b=b, gamma=gamma, beta=beta))
    return layers


def discriminator_forward(x_nchw, layers):
    """x: [N, C, H, W] f32 -> [N, 1, Ho, Wo] f32 (PatchGAN logits)."""
    n = x_nchw.shape[0]
    h = jnp.transpose(x_nchw, (0, 2, 3, 1)).astype(jnp.bfloat16)   # NHWC, once
    for layer in layers:
        cout = layer["w"].shape[0]
        patches, ho, wo = im2col_nhwc(h, 4, 4, layer["stride"], 1)
        m, k = patches.shape
        wmat = layer["w"].reshape(cout, k).T                       # [Cin*16, Cout]

        fuse_act = layer["act"] and not layer["bn"]
        out_dtype = jnp.bfloat16 if fuse_act else jnp.float32
        y_pad, tm = conv_gemm(patches, wmat, layer["b"],
                              negative_slope=0.2 if fuse_act else None,
                              out_dtype=out_dtype)
        if layer["bn"]:
            y_pad = batchnorm_lrelu(y_pad, layer["gamma"], layer["beta"],
                                    m_true=m, cout=cout, tm=tm)
        h = y_pad[:m, :cout].reshape(n, ho, wo, cout)
    return jnp.transpose(h, (0, 3, 1, 2)).astype(jnp.float32)      # NCHW, once


# ------------------------------ pure-JAX reference ----------------------------

def _ref_forward(x_nchw, layers, compute_dtype=jnp.float32):
    """compute_dtype=bfloat16 matches the kernel's MXU precision (bf16 inputs,
    f32 accumulation); float32 gives the exact PyTorch-semantics reference."""
    prec = lax.Precision.HIGHEST if compute_dtype == jnp.float32 else None
    h = x_nchw.astype(compute_dtype)
    y = h
    for layer in layers:
        s = layer["stride"]
        y = lax.conv_general_dilated(
            h, layer["w"].astype(compute_dtype), (s, s), [(1, 1), (1, 1)],
            dimension_numbers=("NCHW", "OIHW", "NCHW"),
            precision=prec, preferred_element_type=jnp.float32)
        if layer["b"] is not None:
            y = y + layer["b"].reshape(1, -1, 1, 1)
        if layer["bn"]:
            mean = y.mean(axis=(0, 2, 3), keepdims=True)
            var = ((y - mean) ** 2).mean(axis=(0, 2, 3), keepdims=True)
            y = ((y - mean) * lax.rsqrt(var + 1e-5)
                 * layer["gamma"].reshape(1, -1, 1, 1)
                 + layer["beta"].reshape(1, -1, 1, 1))
        if layer["act"]:
            y = jnp.where(y > 0, y, 0.2 * y)
        h = y.astype(compute_dtype)
    return y.astype(jnp.float32)


# ----------------------------------- main -------------------------------------

if __name__ == "__main__":
    key = jax.random.PRNGKey(0)
    kx, kp = jax.random.split(key)

    # 32x32 is the smallest spatial size that survives three stride-2 convs and
    # two 4x4 stride-1 convs (pad=1).
    input_nc, ndf, n_layers = 4, 16, 3
    x = jax.random.normal(kx, (2, input_nc, 32, 32), jnp.float32)

    layers = make_discriminator_params(kp, input_nc, ndf=ndf, n_layers=n_layers)

    fwd = jax.jit(lambda xx: discriminator_forward(xx, layers))
    out = jax.block_until_ready(fwd(x))

    ref_bf16 = jax.block_until_ready(_ref_forward(x, layers, jnp.bfloat16))
    ref_f32 = jax.block_until_ready(_ref_forward(x, layers, jnp.float32))

    assert out.shape == ref_f32.shape == (2, 1, 2, 2), out.shape

    err_matched = float(jnp.max(jnp.abs(out - ref_bf16)))
    assert jnp.allclose(out, ref_bf16, atol=1e-2, rtol=1e-2), err_matched

    err_f32 = float(jnp.max(jnp.abs(out - ref_f32)))
    assert jnp.allclose(out, ref_f32, atol=1e-1, rtol=1e-1), err_f32

    print("KERNEL_OK")
</pallas_src>

<mosaic_0001>
module attributes {stable_mosaic.version = 11 : i64} {
  func.func @_gemm_kernel(%arg0: i32, %arg1: i32, %arg2: i32, %arg3: memref<256x64xbf16, #tpu.memory_space<vmem>>, %arg4: memref<64x128xbf16, #tpu.memory_space<vmem>>, %arg5: memref<1x128xf32, #tpu.memory_space<vmem>>, %arg6: memref<256x128xbf16, #tpu.memory_space<vmem>>, %arg7: memref<256x128xf32, #tpu.memory_space<vmem>>) attributes {dimension_semantics = [#tpu.dimension_semantics<parallel>, #tpu.dimension_semantics<parallel>, #tpu.dimension_semantics<arbitrary>], iteration_bounds = array<i64: 2, 1, 1>, scalar_prefetch = 0 : i64, scratch_operands = 1 : i64, tpu.core_type = #tpu.core_type<tc>, window_params = [{transform_indices = @transform_0, window_bounds = array<i64: 256, 64>}, {transform_indices = @transform_1, window_bounds = array<i64: 64, 128>}, {transform_indices = @transform_2, window_bounds = array<i64: 1, 128>}, {transform_indices = @transform_3, window_bounds = array<i64: 256, 128>}]} {
    %c0_i32 = arith.constant 0 : i32
    %0 = arith.cmpi eq, %arg2, %c0_i32 : i32
    %1 = arith.extui %0 : i1 to i32
    %c0_i32_0 = arith.constant 0 : i32
    %2 = arith.cmpi ne, %1, %c0_i32_0 : i32
    scf.if %2 {
      %cst_10 = arith.constant 0.000000e+00 : f32
      %12 = vector.broadcast %cst_10 : f32 to vector<256x128xf32>
      %c0_11 = arith.constant 0 : index
      %c0_12 = arith.constant 0 : index
      %13 = vector.load %arg7[%c0_11, %c0_12] : memref<256x128xf32, #tpu.memory_space<vmem>>, vector<256x128xf32>
      tpu.vector_store %arg7[%c0_11, %c0_12], %12 {strides = array<i32>} : memref<256x128xf32, #tpu.memory_space<vmem>>, vector<256x128xf32>,
    } else {
    }
    %c0 = arith.constant 0 : index
    %c0_1 = arith.constant 0 : index
    %3 = vector.load %arg7[%c0, %c0_1] : memref<256x128xf32, #tpu.memory_space<vmem>>, vector<256x128xf32>
    %c0_2 = arith.constant 0 : index
    %c0_3 = arith.constant 0 : index
    %4 = vector.load %arg3[%c0_2, %c0_3] : memref<256x64xbf16, #tpu.memory_space<vmem>>, vector<256x64xbf16>
    %c0_4 = arith.constant 0 : index
    %c0_5 = arith.constant 0 : index
    %5 = vector.load %arg4[%c0_4, %c0_5] : memref<64x128xbf16, #tpu.memory_space<vmem>>, vector<64x128xbf16>
    %cst = arith.constant dense<0.000000e+00> : vector<256x128xf32>
    %6 = tpu.matmul %4, %5, %cst {dimension_numbers = #tpu.dot_dimension_numbers<[1], [0], [0], [1], [0, 0, 1, 1], [], []>} : vector<256x64xbf16>, vector<64x128xbf16>, vector<256x128xf32> -> vector<256x128xf32>
    %7 = arith.addf %3, %6 : vector<256x128xf32>
    %c0_6 = arith.constant 0 : index
    %c0_7 = arith.constant 0 : index
    %8 = vector.load %arg7[%c0_6, %c0_7] : memref<256x128xf32, #tpu.memory_space<vmem>>, vector<256x128xf32>
    tpu.vector_store %arg7[%c0_6, %c0_7], %7 {strides = array<i32>} : memref<256x128xf32, #tpu.memory_space<vmem>>, vector<256x128xf32>,
    %c0_i32_8 = arith.constant 0 : i32
    %9 = arith.cmpi eq, %arg2, %c0_i32_8 : i32
    %10 = arith.extui %9 : i1 to i32
    %c0_i32_9 = arith.constant 0 : i32
    %11 = arith.cmpi ne, %10, %c0_i32_9 : i32
    scf.if %11 {
      %c0_10 = arith.constant 0 : index
      %c0_11 = arith.constant 0 : index
      %12 = vector.load %arg7[%c0_10, %c0_11] : memref<256x128xf32, #tpu.memory_space<vmem>>, vector<256x128xf32>
      %c0_12 = arith.constant 0 : index
      %c0_13 = arith.constant 0 : index
      %13 = vector.load %arg5[%c0_12, %c0_13] : memref<1x128xf32, #tpu.memory_space<vmem>>, vector<1x128xf32>
      %14 = vector.broadcast %13 : vector<1x128xf32> to vector<256x128xf32>
      %15 = arith.addf %12, %14 : vector<256x128xf32>
      %cst_14 = arith.constant 0.000000e+00 : f32
      %16 = vector.broadcast %cst_14 : f32 to vector<256x128xf32>
      %17 = arith.cmpf ogt, %15, %16 : vector<256x128xf32>
      %cst_15 = arith.constant 2.000000e-01 : f32
      %18 = vector.broadcast %cst_15 : f32 to vector<256x128xf32>
      %19 = arith.mulf %18, %15 : vector<256x128xf32>
      %20 = arith.select %17, %15, %19 : vector<256x128xi1>, vector<256x128xf32>
      %21 = arith.truncf %20 : vector<256x128xf32> to vector<256x128xbf16>
      %c0_16 = arith.constant 0 : index
      %c0_17 = arith.constant 0 : index
      %22 = vector.load %arg6[%c0_16, %c0_17] : memref<256x128xbf16, #tpu.memory_space<vmem>>, vector<256x128xbf16>
      tpu.vector_store %arg6[%c0_16, %c0_17], %21 {strides = array<i32>} : memref<256x128xbf16, #tpu.memory_space<vmem>>, vector<256x128xbf16>,
    } else {
    }
    return
  }
  func.func @transform_0(%arg0: i32, %arg1: i32, %arg2: i32) -> (i32, i32) {
    %c0_i32 = arith.constant 0 : i32
    return %arg0, %arg2 : i32, i32
  }
  func.func @transform_1(%arg0: i32, %arg1: i32, %arg2: i32) -> (i32, i32) {
    %c0_i32 = arith.constant 0 : i32
    return %arg2, %arg1 : i32, i32
  }
  func.func @transform_2(%arg0: i32, %arg1: i32, %arg2: i32) -> (i32, i32) {
    %c0_i32 = arith.constant 0 : i32
    %c0_i32_0 = arith.constant 0 : i32
    return %c0_i32, %arg1 : i32, i32
  }
  func.func @transform_3(%arg0: i32, %arg1: i32, %arg2: i32) -> (i32, i32) {
    %c0_i32 = arith.constant 0 : i32
    return %arg0, %arg1 : i32, i32
  }
}

module attributes {stable_mosaic.version = 11 : i64} {
  func.func @_gemm_kernel(%arg0: i32, %arg1: i32, %arg2: i32, %arg3: memref<128x256xbf16, #tpu.memory_space<vmem>>, %arg4: memref<256x128xbf16, #tpu.memory_space<vmem>>, %arg5: memref<128x128xf32, #tpu.memory_space<vmem>>, %arg6: memref<128x128xf32, #tpu.memory_space<vmem>>) attributes {dimension_semantics = [#tpu.dimension_semantics<parallel>, #tpu.dimension_semantics<parallel>, #tpu.dimension_semantics<arbitrary>], iteration_bounds = array<i64: 1, 1, 1>, scalar_prefetch = 0 : i64, scratch_operands = 1 : i64, tpu.core_type = #tpu.core_type<tc>, window_params = [{transform_indices = @transform_0, window_bounds = array<i64: 128, 256>}, {transform_indices = @transform_1, window_bounds = array<i64: 256, 128>}, {transform_indices = @transform_2, window_bounds = array<i64: 128, 128>}]} {
    %c0_i32 = arith.constant 0 : i32
    %0 = arith.cmpi eq, %arg2, %c0_i32 : i32
    %1 = arith.extui %0 : i1 to i32
    %c0_i32_0 = arith.constant 0 : i32
    %2 = arith.cmpi ne, %1, %c0_i32_0 : i32
    scf.if %2 {
      %cst_10 = arith.constant 0.000000e+00 : f32
      %12 = vector.broadcast %cst_10 : f32 to vector<128x128xf32>
      %c0_11 = arith.constant 0 : index
      %c0_12 = arith.constant 0 : index
      %13 = vector.load %arg6[%c0_11, %c0_12] : memref<128x128xf32, #tpu.memory_space<vmem>>, vector<128x128xf32>
      tpu.vector_store %arg6[%c0_11, %c0_12], %12 {strides = array<i32>} : memref<128x128xf32, #tpu.memory_space<vmem>>, vector<128x128xf32>,
    } else {
    }
    %c0 = arith.constant 0 : index
    %c0_1 = arith.constant 0 : index
    %3 = vector.load %arg6[%c0, %c0_1] : memref<128x128xf32, #tpu.memory_space<vmem>>, vector<128x128xf32>
    %c0_2 = arith.constant 0 : index
    %c0_3 = arith.constant 0 : index
    %4 = vector.load %arg3[%c0_2, %c0_3] : memref<128x256xbf16, #tpu.memory_space<vmem>>, vector<128x256xbf16>
    %c0_4 = arith.constant 0 : index
    %c0_5 = arith.constant 0 : index
    %5 = vector.load %arg4[%c0_4, %c0_5] : memref<256x128xbf16, #tpu.memory_space<vmem>>, vector<256x128xbf16>
    %cst = arith.constant dense<0.000000e+00> : vector<128x128xf32>
    %6 = tpu.matmul %4, %5, %cst {dimension_numbers = #tpu.dot_dimension_numbers<[1], [0], [0], [1], [0, 0, 1, 1], [], []>} : vector<128x256xbf16>, vector<256x128xbf16>, vector<128x128xf32> -> vector<128x128xf32>
    %7 = arith.addf %3, %6 : vector<128x128xf32>
    %c0_6 = arith.constant 0 : index
    %c0_7 = arith.constant 0 : index
    %8 = vector.load %arg6[%c0_6, %c0_7] : memref<128x128xf32, #tpu.memory_space<vmem>>, vector<128x128xf32>
    tpu.vector_store %arg6[%c0_6, %c0_7], %7 {strides = array<i32>} : memref<128x128xf32, #tpu.memory_space<vmem>>, vector<128x128xf32>,
    %c0_i32_8 = arith.constant 0 : i32
    %9 = arith.cmpi eq, %arg2, %c0_i32_8 : i32
    %10 = arith.extui %9 : i1 to i32
    %c0_i32_9 = arith.constant 0 : i32
    %11 = arith.cmpi ne, %10, %c0_i32_9 : i32
    scf.if %11 {
      %c0_10 = arith.constant 0 : index
      %c0_11 = arith.constant 0 : index
      %12 = vector.load %arg6[%c0_10, %c0_11] : memref<128x128xf32, #tpu.memory_space<vmem>>, vector<128x128xf32>
      %c0_12 = arith.constant 0 : index
      %c0_13 = arith.constant 0 : index
      %13 = vector.load %arg5[%c0_12, %c0_13] : memref<128x128xf32, #tpu.memory_space<vmem>>, vector<128x128xf32>
      tpu.vector_store %arg5[%c0_12, %c0_13], %12 {strides = array<i32>} : memref<128x128xf32, #tpu.memory_space<vmem>>, vector<128x128xf32>,
    } else {
    }
    return
  }
  func.func @transform_0(%arg0: i32, %arg1: i32, %arg2: i32) -> (i32, i32) {
    %c0_i32 = arith.constant 0 : i32
    return %arg0, %arg2 : i32, i32
  }
  func.func @transform_1(%arg0: i32, %arg1: i32, %arg2: i32) -> (i32, i32) {
    %c0_i32 = arith.constant 0 : i32
    return %arg2, %arg1 : i32, i32
  }
  func.func @transform_2(%arg0: i32, %arg1: i32, %arg2: i32) -> (i32, i32) {
    %c0_i32 = arith.constant 0 : i32
    return %arg0, %arg1 : i32, i32
  }
}

module attributes {stable_mosaic.version = 11 : i64} {
  func.func @_bn_stats_kernel(%arg0: i32, %arg1: i32, %arg2: memref<128x128xf32, #tpu.memory_space<vmem>>, %arg3: memref<1x128xf32, #tpu.memory_space<vmem>>, %arg4: memref<1x128xf32, #tpu.memory_space<vmem>>, %arg5: memref<1x128xf32, #tpu.memory_space<vmem>>, %arg6: memref<1x128xf32, #tpu.memory_space<vmem>>) attributes {dimension_semantics = [#tpu.dimension_semantics<parallel>, #tpu.dimension_semantics<arbitrary>], iteration_bounds = array<i64: 1, 1>, scalar_prefetch = 0 : i64, scratch_operands = 2 : i64, tpu.core_type = #tpu.core_type<tc>, window_params = [{transform_indices = @transform_0, window_bounds = array<i64: 128, 128>}, {transform_indices = @transform_1, window_bounds = array<i64: 1, 128>}, {transform_indices = @transform_2, window_bounds = array<i64: 1, 128>}]} {
    %c0_i32 = arith.constant 0 : i32
    %0 = arith.cmpi eq, %arg1, %c0_i32 : i32
    %1 = arith.extui %0 : i1 to i32
    %c0_i32_0 = arith.constant 0 : i32
    %2 = arith.cmpi ne, %1, %c0_i32_0 : i32
    scf.if %2 {
      %cst_13 = arith.constant 0.000000e+00 : f32
      %18 = vector.broadcast %cst_13 : f32 to vector<1x128xf32>
      %c0_14 = arith.constant 0 : index
      %c0_15 = arith.constant 0 : index
      %19 = vector.load %arg5[%c0_14, %c0_15] : memref<1x128xf32, #tpu.memory_space<vmem>>, vector<1x128xf32>
      tpu.vector_store %arg5[%c0_14, %c0_15], %18 {strides = array<i32>} : memref<1x128xf32, #tpu.memory_space<vmem>>, vector<1x128xf32>,
      %cst_16 = arith.constant 0.000000e+00 : f32
      %20 = vector.broadcast %cst_16 : f32 to vector<1x128xf32>
      %c0_17 = arith.constant 0 : index
      %c0_18 = arith.constant 0 : index
      %21 = vector.load %arg6[%c0_17, %c0_18] : memref<1x128xf32, #tpu.memory_space<vmem>>, vector<1x128xf32>
      tpu.vector_store %arg6[%c0_17, %c0_18], %20 {strides = array<i32>} : memref<1x128xf32, #tpu.memory_space<vmem>>, vector<1x128xf32>,
    } else {
    }
    %c0 = arith.constant 0 : index
    %c0_1 = arith.constant 0 : index
    %3 = vector.load %arg2[%c0, %c0_1] : memref<128x128xf32, #tpu.memory_space<vmem>>, vector<128x128xf32>
    %c0_2 = arith.constant 0 : index
    %c0_3 = arith.constant 0 : index
    %4 = vector.load %arg5[%c0_2, %c0_3] : memref<1x128xf32, #tpu.memory_space<vmem>>, vector<1x128xf32>
    %cst = arith.constant dense<0.000000e+00> : vector<128xf32>
    %5 = vector.multi_reduction <add>, %3, %cst [0] : vector<128x128xf32> to vector<128xf32>
    %6 = vector.shape_cast %5 : vector<128xf32> to vector<1x128xf32>
    %7 = arith.addf %4, %6 : vector<1x128xf32>
    %c0_4 = arith.constant 0 : index
    %c0_5 = arith.constant 0 : index
    %8 = vector.load %arg5[%c0_4, %c0_5] : memref<1x128xf32, #tpu.memory_space<vmem>>, vector<1x128xf32>
    tpu.vector_store %arg5[%c0_4, %c0_5], %7 {strides = array<i32>} : memref<1x128xf32, #tpu.memory_space<vmem>>, vector<1x128xf32>,
    %c0_6 = arith.constant 0 : index
    %c0_7 = arith.constant 0 : index
    %9 = vector.load %arg6[%c0_6, %c0_7] : memref<1x128xf32, #tpu.memory_space<vmem>>, vector<1x128xf32>
    %10 = arith.mulf %3, %3 : vector<128x128xf32>
    %cst_8 = arith.constant dense<0.000000e+00> : vector<128xf32>
    %11 = vector.multi_reduction <add>, %10, %cst_8 [0] : vector<128x128xf32> to vector<128xf32>
    %12 = vector.shape_cast %11 : vector<128xf32> to vector<1x128xf32>
    %13 = arith.addf %9, %12 : vector<1x128xf32>
    %c0_9 = arith.constant 0 : index
    %c0_10 = arith.constant 0 : index
    %14 = vector.load %arg6[%c0_9, %c0_10] : memref<1x128xf32, #tpu.memory_space<vmem>>, vector<1x128xf32>
    tpu.vector_store %arg6[%c0_9, %c0_10], %13 {strides = array<i32>} : memref<1x128xf32, #tpu.memory_space<vmem>>, vector<1x128xf32>,
    %c0_i32_11 = arith.constant 0 : i32
    %15 = arith.cmpi eq, %arg1, %c0_i32_11 : i32
    %16 = arith.extui %15 : i1 to i32
    %c0_i32_12 = arith.constant 0 : i32
    %17 = arith.cmpi ne, %16, %c0_i32_12 : i32
    scf.if %17 {
      %c0_13 = arith.constant 0 : index
      %c0_14 = arith.constant 0 : index
      %18 = vector.load %arg5[%c0_13, %c0_14] : memref<1x128xf32, #tpu.memory_space<vmem>>, vector<1x128xf32>
      %c0_15 = arith.constant 0 : index
      %c0_16 = arith.constant 0 : index
      %19 = vector.load %arg3[%c0_15, %c0_16] : memref<1x128xf32, #tpu.memory_space<vmem>>, vector<1x128xf32>
      tpu.vector_store %arg3[%c0_15, %c0_16], %18 {strides = array<i32>} : memref<1x128xf32, #tpu.memory_space<vmem>>, vector<1x128xf32>,
      %c0_17 = arith.constant 0 : index
      %c0_18 = arith.constant 0 : index
      %20 = vector.load %arg6[%c0_17, %c0_18] : memref<1x128xf32, #tpu.memory_space<vmem>>, vector<1x128xf32>
      %c0_19 = arith.constant 0 : index
      %c0_20 = arith.constant 0 : index
      %21 = vector.load %arg4[%c0_19, %c0_20] : memref<1x128xf32, #tpu.memory_space<vmem>>, vector<1x128xf32>
      tpu.vector_store %arg4[%c0_19, %c0_20], %20 {strides = array<i32>} : memref<1x128xf32, #tpu.memory_space<vmem>>, vector<1x128xf32>,
    } else {
    }
    return
  }
  func.func @transform_0(%arg0: i32, %arg1: i32) -> (i32, i32) {
    %c0_i32 = arith.constant 0 : i32
    return %arg1, %arg0 : i32, i32
  }
  func.func @transform_1(%arg0: i32, %arg1: i32) -> (i32, i32) {
    %c0_i32 = arith.constant 0 : i32
    %c0_i32_0 = arith.constant 0 : i32
    return %c0_i32, %arg0 : i32, i32
  }
  func.func @transform_2(%arg0: i32, %arg1: i32) -> (i32, i32) {
    %c0_i32 = arith.constant 0 : i32
    %c0_i32_0 = arith.constant 0 : i32
    return %c0_i32, %arg0 : i32, i32
  }
}

module attributes {stable_mosaic.version = 11 : i64} {
  func.func @_bn_norm_kernel(%arg0: i32, %arg1: i32, %arg2: memref<128x128xf32, #tpu.memory_space<vmem>>, %arg3: memref<1x128xf32, #tpu.memory_space<vmem>>, %arg4: memref<1x128xf32, #tpu.memory_space<vmem>>, %arg5: memref<128x128xbf16, #tpu.memory_space<vmem>>) attributes {dimension_semantics = [#tpu.dimension_semantics<parallel>, #tpu.dimension_semantics<parallel>], iteration_bounds = array<i64: 1, 1>, scalar_prefetch = 0 : i64, scratch_operands = 0 : i64, tpu.core_type = #tpu.core_type<tc>, window_params = [{transform_indices = @transform_0, window_bounds = array<i64: 128, 128>}, {transform_indices = @transform_1, window_bounds = array<i64: 1, 128>}, {transform_indices = @transform_2, window_bounds = array<i64: 1, 128>}, {transform_indices = @transform_3, window_bounds = array<i64: 128, 128>}]} {
    %c0 = arith.constant 0 : index
    %c0_0 = arith.constant 0 : index
    %0 = vector.load %arg2[%c0, %c0_0] : memref<128x128xf32, #tpu.memory_space<vmem>>, vector<128x128xf32>
    %c0_1 = arith.constant 0 : index
    %c0_2 = arith.constant 0 : index
    %1 = vector.load %arg3[%c0_1, %c0_2] : memref<1x128xf32, #tpu.memory_space<vmem>>, vector<1x128xf32>
    %2 = vector.broadcast %1 : vector<1x128xf32> to vector<128x128xf32>
    %3 = arith.mulf %0, %2 : vector<128x128xf32>
    %c0_3 = arith.constant 0 : index
    %c0_4 = arith.constant 0 : index
    %4 = vector.load %arg4[%c0_3, %c0_4] : memref<1x128xf32, #tpu.memory_space<vmem>>, vector<1x128xf32>
    %5 = vector.broadcast %4 : vector<1x128xf32> to vector<128x128xf32>
    %6 = arith.addf %3, %5 : vector<128x128xf32>
    %cst = arith.constant 0.000000e+00 : f32
    %7 = vector.broadcast %cst : f32 to vector<128x128xf32>
    %8 = arith.cmpf ogt, %6, %7 : vector<128x128xf32>
    %cst_5 = arith.constant 2.000000e-01 : f32
    %9 = vector.broadcast %cst_5 : f32 to vector<128x128xf32>
    %10 = arith.mulf %9, %6 : vector<128x128xf32>
    %11 = arith.select %8, %6, %10 : vector<128x128xi1>, vector<128x128xf32>
    %12 = arith.truncf %11 : vector<128x128xf32> to vector<128x128xbf16>
    %c0_6 = arith.constant 0 : index
    %c0_7 = arith.constant 0 : index
    %13 = vector.load %arg5[%c0_6, %c0_7] : memref<128x128xbf16, #tpu.memory_space<vmem>>, vector<128x128xbf16>
    tpu.vector_store %arg5[%c0_6, %c0_7], %12 {strides = array<i32>} : memref<128x128xbf16, #tpu.memory_space<vmem>>, vector<128x128xbf16>,
    return
  }
  func.func @transform_0(%arg0: i32, %arg1: i32) -> (i32, i32) {
    %c0_i32 = arith.constant 0 : i32
    return %arg0, %arg1 : i32, i32
  }
  func.func @transform_1(%arg0: i32, %arg1: i32) -> (i32, i32) {
    %c0_i32 = arith.constant 0 : i32
    %c0_i32_0 = arith.constant 0 : i32
    return %c0_i32, %arg1 : i32, i32
  }
  func.func @transform_2(%arg0: i32, %arg1: i32) -> (i32, i32) {
    %c0_i32 = arith.constant 0 : i32
    %c0_i32_0 = arith.constant 0 : i32
    return %c0_i32, %arg1 : i32, i32
  }
  func.func @transform_3(%arg0: i32, %arg1: i32) -> (i32, i32) {
    %c0_i32 = arith.constant 0 : i32
    return %arg0, %arg1 : i32, i32
  }
}

module attributes {stable_mosaic.version = 11 : i64} {
  func.func @_gemm_kernel(%arg0: i32, %arg1: i32, %arg2: i32, %arg3: memref<32x512xbf16, #tpu.memory_space<vmem>>, %arg4: memref<512x128xbf16, #tpu.memory_space<vmem>>, %arg5: memref<32x128xf32, #tpu.memory_space<vmem>>, %arg6: memref<32x128xf32, #tpu.memory_space<vmem>>) attributes {dimension_semantics = [#tpu.dimension_semantics<parallel>, #tpu.dimension_semantics<parallel>, #tpu.dimension_semantics<arbitrary>], iteration_bounds = array<i64: 1, 1, 1>, scalar_prefetch = 0 : i64, scratch_operands = 1 : i64, tpu.core_type = #tpu.core_type<tc>, window_params = [{transform_indices = @transform_0, window_bounds = array<i64: 32, 512>}, {transform_indices = @transform_1, window_bounds = array<i64: 512, 128>}, {transform_indices = @transform_2, window_bounds = array<i64: 32, 128>}]} {
    %c0_i32 = arith.constant 0 : i32
    %0 = arith.cmpi eq, %arg2, %c0_i32 : i32
    %1 = arith.extui %0 : i1 to i32
    %c0_i32_0 = arith.constant 0 : i32
    %2 = arith.cmpi ne, %1, %c0_i32_0 : i32
    scf.if %2 {
      %cst_10 = arith.constant 0.000000e+00 : f32
      %12 = vector.broadcast %cst_10 : f32 to vector<32x128xf32>
      %c0_11 = arith.constant 0 : index
      %c0_12 = arith.constant 0 : index
      %13 = vector.load %arg6[%c0_11, %c0_12] : memref<32x128xf32, #tpu.memory_space<vmem>>, vector<32x128xf32>
      tpu.vector_store %arg6[%c0_11, %c0_12], %12 {strides = array<i32>} : memref<32x128xf32, #tpu.memory_space<vmem>>, vector<32x128xf32>,
    } else {
    }
    %c0 = arith.constant 0 : index
    %c0_1 = arith.constant 0 : index
    %3 = vector.load %arg6[%c0, %c0_1] : memref<32x128xf32, #tpu.memory_space<vmem>>, vector<32x128xf32>
    %c0_2 = arith.constant 0 : index
    %c0_3 = arith.constant 0 : index
    %4 = vector.load %arg3[%c0_2, %c0_3] : memref<32x512xbf16, #tpu.memory_space<vmem>>, vector<32x512xbf16>
    %c0_4 = arith.constant 0 : index
    %c0_5 = arith.constant 0 : index
    %5 = vector.load %arg4[%c0_4, %c0_5] : memref<512x128xbf16, #tpu.memory_space<vmem>>, vector<512x128xbf16>
    %cst = arith.constant dense<0.000000e+00> : vector<32x128xf32>
    %6 = tpu.matmul %4, %5, %cst {dimension_numbers = #tpu.dot_dimension_numbers<[1], [0], [0], [1], [0, 0, 1, 1], [], []>} : vector<32x512xbf16>, vector<512x128xbf16>, vector<32x128xf32> -> vector<32x128xf32>
    %7 = arith.addf %3, %6 : vector<32x128xf32>
    %c0_6 = arith.constant 0 : index
    %c0_7 = arith.constant 0 : index
    %8 = vector.load %arg6[%c0_6, %c0_7] : memref<32x128xf32, #tpu.memory_space<vmem>>, vector<32x128xf32>
    tpu.vector_store %arg6[%c0_6, %c0_7], %7 {strides = array<i32>} : memref<32x128xf32, #tpu.memory_space<vmem>>, vector<32x128xf32>,
    %c0_i32_8 = arith.constant 0 : i32
    %9 = arith.cmpi eq, %arg2, %c0_i32_8 : i32
    %10 = arith.extui %9 : i1 to i32
    %c0_i32_9 = arith.constant 0 : i32
    %11 = arith.cmpi ne, %10, %c0_i32_9 : i32
    scf.if %11 {
      %c0_10 = arith.constant 0 : index
      %c0_11 = arith.constant 0 : index
      %12 = vector.load %arg6[%c0_10, %c0_11] : memref<32x128xf32, #tpu.memory_space<vmem>>, vector<32x128xf32>
      %c0_12 = arith.constant 0 : index
      %c0_13 = arith.constant 0 : index
      %13 = vector.load %arg5[%c0_12, %c0_13] : memref<32x128xf32, #tpu.memory_space<vmem>>, vector<32x128xf32>
      tpu.vector_store %arg5[%c0_12, %c0_13], %12 {strides = array<i32>} : memref<32x128xf32, #tpu.memory_space<vmem>>, vector<32x128xf32>,
    } else {
    }
    return
  }
  func.func @transform_0(%arg0: i32, %arg1: i32, %arg2: i32) -> (i32, i32) {
    %c0_i32 = arith.constant 0 : i32
    return %arg0, %arg2 : i32, i32
  }
  func.func @transform_1(%arg0: i32, %arg1: i32, %arg2: i32) -> (i32, i32) {
    %c0_i32 = arith.constant 0 : i32
    return %arg2, %arg1 : i32, i32
  }
  func.func @transform_2(%arg0: i32, %arg1: i32, %arg2: i32) -> (i32, i32) {
    %c0_i32 = arith.constant 0 : i32
    return %arg0, %arg1 : i32, i32
  }
}

module attributes {stable_mosaic.version = 11 : i64} {
  func.func @_bn_stats_kernel(%arg0: i32, %arg1: i32, %arg2: memref<32x128xf32, #tpu.memory_space<vmem>>, %arg3: memref<1x128xf32, #tpu.memory_space<vmem>>, %arg4: memref<1x128xf32, #tpu.memory_space<vmem>>, %arg5: memref<1x128xf32, #tpu.memory_space<vmem>>, %arg6: memref<1x128xf32, #tpu.memory_space<vmem>>) attributes {dimension_semantics = [#tpu.dimension_semantics<parallel>, #tpu.dimension_semantics<arbitrary>], iteration_bounds = array<i64: 1, 1>, scalar_prefetch = 0 : i64, scratch_operands = 2 : i64, tpu.core_type = #tpu.core_type<tc>, window_params = [{transform_indices = @transform_0, window_bounds = array<i64: 32, 128>}, {transform_indices = @transform_1, window_bounds = array<i64: 1, 128>}, {transform_indices = @transform_2, window_bounds = array<i64: 1, 128>}]} {
    %c0_i32 = arith.constant 0 : i32
    %0 = arith.cmpi eq, %arg1, %c0_i32 : i32
    %1 = arith.extui %0 : i1 to i32
    %c0_i32_0 = arith.constant 0 : i32
    %2 = arith.cmpi ne, %1, %c0_i32_0 : i32
    scf.if %2 {
      %cst_13 = arith.constant 0.000000e+00 : f32
      %18 = vector.broadcast %cst_13 : f32 to vector<1x128xf32>
      %c0_14 = arith.constant 0 : index
      %c0_15 = arith.constant 0 : index
      %19 = vector.load %arg5[%c0_14, %c0_15] : memref<1x128xf32, #tpu.memory_space<vmem>>, vector<1x128xf32>
      tpu.vector_store %arg5[%c0_14, %c0_15], %18 {strides = array<i32>} : memref<1x128xf32, #tpu.memory_space<vmem>>, vector<1x128xf32>,
      %cst_16 = arith.constant 0.000000e+00 : f32
      %20 = vector.broadcast %cst_16 : f32 to vector<1x128xf32>
      %c0_17 = arith.constant 0 : index
      %c0_18 = arith.constant 0 : index
      %21 = vector.load %arg6[%c0_17, %c0_18] : memref<1x128xf32, #tpu.memory_space<vmem>>, vector<1x128xf32>
      tpu.vector_store %arg6[%c0_17, %c0_18], %20 {strides = array<i32>} : memref<1x128xf32, #tpu.memory_space<vmem>>, vector<1x128xf32>,
    } else {
    }
    %c0 = arith.constant 0 : index
    %c0_1 = arith.constant 0 : index
    %3 = vector.load %arg2[%c0, %c0_1] : memref<32x128xf32, #tpu.memory_space<vmem>>, vector<32x128xf32>
    %c0_2 = arith.constant 0 : index
    %c0_3 = arith.constant 0 : index
    %4 = vector.load %arg5[%c0_2, %c0_3] : memref<1x128xf32, #tpu.memory_space<vmem>>, vector<1x128xf32>
    %cst = arith.constant dense<0.000000e+00> : vector<128xf32>
    %5 = vector.multi_reduction <add>, %3, %cst [0] : vector<32x128xf32> to vector<128xf32>
    %6 = vector.shape_cast %5 : vector<128xf32> to vector<1x128xf32>
    %7 = arith.addf %4, %6 : vector<1x128xf32>
    %c0_4 = arith.constant 0 : index
    %c0_5 = arith.constant 0 : index
    %8 = vector.load %arg5[%c0_4, %c0_5] : memref<1x128xf32, #tpu.memory_space<vmem>>, vector<1x128xf32>
    tpu.vector_store %arg5[%c0_4, %c0_5], %7 {strides = array<i32>} : memref<1x128xf32, #tpu.memory_space<vmem>>, vector<1x128xf32>,
    %c0_6 = arith.constant 0 : index
    %c0_7 = arith.constant 0 : index
    %9 = vector.load %arg6[%c0_6, %c0_7] : memref<1x128xf32, #tpu.memory_space<vmem>>, vector<1x128xf32>
    %10 = arith.mulf %3, %3 : vector<32x128xf32>
    %cst_8 = arith.constant dense<0.000000e+00> : vector<128xf32>
    %11 = vector.multi_reduction <add>, %10, %cst_8 [0] : vector<32x128xf32> to vector<128xf32>
    %12 = vector.shape_cast %11 : vector<128xf32> to vector<1x128xf32>
    %13 = arith.addf %9, %12 : vector<1x128xf32>
    %c0_9 = arith.constant 0 : index
    %c0_10 = arith.constant 0 : index
    %14 = vector.load %arg6[%c0_9, %c0_10] : memref<1x128xf32, #tpu.memory_space<vmem>>, vector<1x128xf32>
    tpu.vector_store %arg6[%c0_9, %c0_10], %13 {strides = array<i32>} : memref<1x128xf32, #tpu.memory_space<vmem>>, vector<1x128xf32>,
    %c0_i32_11 = arith.constant 0 : i32
    %15 = arith.cmpi eq, %arg1, %c0_i32_11 : i32
    %16 = arith.extui %15 : i1 to i32
    %c0_i32_12 = arith.constant 0 : i32
    %17 = arith.cmpi ne, %16, %c0_i32_12 : i32
    scf.if %17 {
      %c0_13 = arith.constant 0 : index
      %c0_14 = arith.constant 0 : index
      %18 = vector.load %arg5[%c0_13, %c0_14] : memref<1x128xf32, #tpu.memory_space<vmem>>, vector<1x128xf32>
      %c0_15 = arith.constant 0 : index
      %c0_16 = arith.constant 0 : index
      %19 = vector.load %arg3[%c0_15, %c0_16] : memref<1x128xf32, #tpu.memory_space<vmem>>, vector<1x128xf32>
      tpu.vector_store %arg3[%c0_15, %c0_16], %18 {strides = array<i32>} : memref<1x128xf32, #tpu.memory_space<vmem>>, vector<1x128xf32>,
      %c0_17 = arith.constant 0 : index
      %c0_18 = arith.constant 0 : index
      %20 = vector.load %arg6[%c0_17, %c0_18] : memref<1x128xf32, #tpu.memory_space<vmem>>, vector<1x128xf32>
      %c0_19 = arith.constant 0 : index
      %c0_20 = arith.constant 0 : index
      %21 = vector.load %arg4[%c0_19, %c0_20] : memref<1x128xf32, #tpu.memory_space<vmem>>, vector<1x128xf32>
      tpu.vector_store %arg4[%c0_19, %c0_20], %20 {strides = array<i32>} : memref<1x128xf32, #tpu.memory_space<vmem>>, vector<1x128xf32>,
    } else {
    }
    return
  }
  func.func @transform_0(%arg0: i32, %arg1: i32) -> (i32, i32) {
    %c0_i32 = arith.constant 0 : i32
    return %arg1, %arg0 : i32, i32
  }
  func.func @transform_1(%arg0: i32, %arg1: i32) -> (i32, i32) {
    %c0_i32 = arith.constant 0 : i32
    %c0_i32_0 = arith.constant 0 : i32
    return %c0_i32, %arg0 : i32, i32
  }
  func.func @transform_2(%arg0: i32, %arg1: i32) -> (i32, i32) {
    %c0_i32 = arith.constant 0 : i32
    %c0_i32_0 = arith.constant 0 : i32
    return %c0_i32, %arg0 : i32, i32
  }
}

module attributes {stable_mosaic.version = 11 : i64} {
  func.func @_bn_norm_kernel(%arg0: i32, %arg1: i32, %arg2: memref<32x128xf32, #tpu.memory_space<vmem>>, %arg3: memref<1x128xf32, #tpu.memory_space<vmem>>, %arg4: memref<1x128xf32, #tpu.memory_space<vmem>>, %arg5: memref<32x128xbf16, #tpu.memory_space<vmem>>) attributes {dimension_semantics = [#tpu.dimension_semantics<parallel>, #tpu.dimension_semantics<parallel>], iteration_bounds = array<i64: 1, 1>, scalar_prefetch = 0 : i64, scratch_operands = 0 : i64, tpu.core_type = #tpu.core_type<tc>, window_params = [{transform_indices = @transform_0, window_bounds = array<i64: 32, 128>}, {transform_indices = @transform_1, window_bounds = array<i64: 1, 128>}, {transform_indices = @transform_2, window_bounds = array<i64: 1, 128>}, {transform_indices = @transform_3, window_bounds = array<i64: 32, 128>}]} {
    %c0 = arith.constant 0 : index
    %c0_0 = arith.constant 0 : index
    %0 = vector.load %arg2[%c0, %c0_0] : memref<32x128xf32, #tpu.memory_space<vmem>>, vector<32x128xf32>
    %c0_1 = arith.constant 0 : index
    %c0_2 = arith.constant 0 : index
    %1 = vector.load %arg3[%c0_1, %c0_2] : memref<1x128xf32, #tpu.memory_space<vmem>>, vector<1x128xf32>
    %2 = vector.broadcast %1 : vector<1x128xf32> to vector<32x128xf32>
    %3 = arith.mulf %0, %2 : vector<32x128xf32>
    %c0_3 = arith.constant 0 : index
    %c0_4 = arith.constant 0 : index
    %4 = vector.load %arg4[%c0_3, %c0_4] : memref<1x128xf32, #tpu.memory_space<vmem>>, vector<1x128xf32>
    %5 = vector.broadcast %4 : vector<1x128xf32> to vector<32x128xf32>
    %6 = arith.addf %3, %5 : vector<32x128xf32>
    %cst = arith.constant 0.000000e+00 : f32
    %7 = vector.broadcast %cst : f32 to vector<32x128xf32>
    %8 = arith.cmpf ogt, %6, %7 : vector<32x128xf32>
    %cst_5 = arith.constant 2.000000e-01 : f32
    %9 = vector.broadcast %cst_5 : f32 to vector<32x128xf32>
    %10 = arith.mulf %9, %6 : vector<32x128xf32>
    %11 = arith.select %8, %6, %10 : vector<32x128xi1>, vector<32x128xf32>
    %12 = arith.truncf %11 : vector<32x128xf32> to vector<32x128xbf16>
    %c0_6 = arith.constant 0 : index
    %c0_7 = arith.constant 0 : index
    %13 = vector.load %arg5[%c0_6, %c0_7] : memref<32x128xbf16, #tpu.memory_space<vmem>>, vector<32x128xbf16>
    tpu.vector_store %arg5[%c0_6, %c0_7], %12 {strides = array<i32>} : memref<32x128xbf16, #tpu.memory_space<vmem>>, vector<32x128xbf16>,
    return
  }
  func.func @transform_0(%arg0: i32, %arg1: i32) -> (i32, i32) {
    %c0_i32 = arith.constant 0 : i32
    return %arg0, %arg1 : i32, i32
  }
  func.func @transform_1(%arg0: i32, %arg1: i32) -> (i32, i32) {
    %c0_i32 = arith.constant 0 : i32
    %c0_i32_0 = arith.constant 0 : i32
    return %c0_i32, %arg1 : i32, i32
  }
  func.func @transform_2(%arg0: i32, %arg1: i32) -> (i32, i32) {
    %c0_i32 = arith.constant 0 : i32
    %c0_i32_0 = arith.constant 0 : i32
    return %c0_i32, %arg1 : i32, i32
  }
  func.func @transform_3(%arg0: i32, %arg1: i32) -> (i32, i32) {
    %c0_i32 = arith.constant 0 : i32
    return %arg0, %arg1 : i32, i32
  }
}

module attributes {stable_mosaic.version = 11 : i64} {
  func.func @_gemm_kernel(%arg0: i32, %arg1: i32, %arg2: i32, %arg3: memref<24x512xbf16, #tpu.memory_space<vmem>>, %arg4: memref<512x128xbf16, #tpu.memory_space<vmem>>, %arg5: memref<24x128xf32, #tpu.memory_space<vmem>>, %arg6: memref<24x128xf32, #tpu.memory_space<vmem>>) attributes {dimension_semantics = [#tpu.dimension_semantics<parallel>, #tpu.dimension_semantics<parallel>, #tpu.dimension_semantics<arbitrary>], iteration_bounds = array<i64: 1, 1, 2>, scalar_prefetch = 0 : i64, scratch_operands = 1 : i64, tpu.core_type = #tpu.core_type<tc>, window_params = [{transform_indices = @transform_0, window_bounds = array<i64: 24, 512>}, {transform_indices = @transform_1, window_bounds = array<i64: 512, 128>}, {transform_indices = @transform_2, window_bounds = array<i64: 24, 128>}]} {
    %c0_i32 = arith.constant 0 : i32
    %0 = arith.cmpi eq, %arg2, %c0_i32 : i32
    %1 = arith.extui %0 : i1 to i32
    %c0_i32_0 = arith.constant 0 : i32
    %2 = arith.cmpi ne, %1, %c0_i32_0 : i32
    scf.if %2 {
      %cst_9 = arith.constant 0.000000e+00 : f32
      %12 = vector.broadcast %cst_9 : f32 to vector<24x128xf32>
      %c0_10 = arith.constant 0 : index
      %c0_11 = arith.constant 0 : index
      %13 = vector.load %arg6[%c0_10, %c0_11] : memref<24x128xf32, #tpu.memory_space<vmem>>, vector<24x128xf32>
      tpu.vector_store %arg6[%c0_10, %c0_11], %12 {strides = array<i32>} : memref<24x128xf32, #tpu.memory_space<vmem>>, vector<24x128xf32>,
    } else {
    }
    %c0 = arith.constant 0 : index
    %c0_1 = arith.constant 0 : index
    %3 = vector.load %arg6[%c0, %c0_1] : memref<24x128xf32, #tpu.memory_space<vmem>>, vector<24x128xf32>
    %c0_2 = arith.constant 0 : index
    %c0_3 = arith.constant 0 : index
    %4 = vector.load %arg3[%c0_2, %c0_3] : memref<24x512xbf16, #tpu.memory_space<vmem>>, vector<24x512xbf16>
    %c0_4 = arith.constant 0 : index
    %c0_5 = arith.constant 0 : index
    %5 = vector.load %arg4[%c0_4, %c0_5] : memref<512x128xbf16, #tpu.memory_space<vmem>>, vector<512x128xbf16>
    %cst = arith.constant dense<0.000000e+00> : vector<24x128xf32>
    %6 = tpu.matmul %4, %5, %cst {dimension_numbers = #tpu.dot_dimension_numbers<[1], [0], [0], [1], [0, 0, 1, 1], [], []>} : vector<24x512xbf16>, vector<512x128xbf16>, vector<24x128xf32> -> vector<24x128xf32>
    %7 = arith.addf %3, %6 : vector<24x128xf32>
    %c0_6 = arith.constant 0 : index
    %c0_7 = arith.constant 0 : index
    %8 = vector.load %arg6[%c0_6, %c0_7] : memref<24x128xf32, #tpu.memory_space<vmem>>, vector<24x128xf32>
    tpu.vector_store %arg6[%c0_6, %c0_7], %7 {strides = array<i32>} : memref<24x128xf32, #tpu.memory_space<vmem>>, vector<24x128xf32>,
    %c1_i32 = arith.constant 1 : i32
    %9 = arith.cmpi eq, %arg2, %c1_i32 : i32
    %10 = arith.extui %9 : i1 to i32
    %c0_i32_8 = arith.constant 0 : i32
    %11 = arith.cmpi ne, %10, %c0_i32_8 : i32
    scf.if %11 {
      %c0_9 = arith.constant 0 : index
      %c0_10 = arith.constant 0 : index
      %12 = vector.load %arg6[%c0_9, %c0_10] : memref<24x128xf32, #tpu.memory_space<vmem>>, vector<24x128xf32>
      %c0_11 = arith.constant 0 : index
      %c0_12 = arith.constant 0 : index
      %13 = vector.load %arg5[%c0_11, %c0_12] : memref<24x128xf32, #tpu.memory_space<vmem>>, vector<24x128xf32>
      tpu.vector_store %arg5[%c0_11, %c0_12], %12 {strides = array<i32>} : memref<24x128xf32, #tpu.memory_space<vmem>>, vector<24x128xf32>,
    } else {
    }
    return
  }
  func.func @transform_0(%arg0: i32, %arg1: i32, %arg2: i32) -> (i32, i32) {
    %c0_i32 = arith.constant 0 : i32
    return %arg0, %arg2 : i32, i32
  }
  func.func @transform_1(%arg0: i32, %arg1: i32, %arg2: i32) -> (i32, i32) {
    %c0_i32 = arith.constant 0 : i32
    return %arg2, %arg1 : i32, i32
  }
  func.func @transform_2(%arg0: i32, %arg1: i32, %arg2: i32) -> (i32, i32) {
    %c0_i32 = arith.constant 0 : i32
    return %arg0, %arg1 : i32, i32
  }
}

module attributes {stable_mosaic.version = 11 : i64} {
  func.func @_bn_stats_kernel(%arg0: i32, %arg1: i32, %arg2: memref<24x128xf32, #tpu.memory_space<vmem>>, %arg3: memref<1x128xf32, #tpu.memory_space<vmem>>, %arg4: memref<1x128xf32, #tpu.memory_space<vmem>>, %arg5: memref<1x128xf32, #tpu.memory_space<vmem>>, %arg6: memref<1x128xf32, #tpu.memory_space<vmem>>) attributes {dimension_semantics = [#tpu.dimension_semantics<parallel>, #tpu.dimension_semantics<arbitrary>], iteration_bounds = array<i64: 1, 1>, scalar_prefetch = 0 : i64, scratch_operands = 2 : i64, tpu.core_type = #tpu.core_type<tc>, window_params = [{transform_indices = @transform_0, window_bounds = array<i64: 24, 128>}, {transform_indices = @transform_1, window_bounds = array<i64: 1, 128>}, {transform_indices = @transform_2, window_bounds = array<i64: 1, 128>}]} {
    %c0_i32 = arith.constant 0 : i32
    %0 = arith.cmpi eq, %arg1, %c0_i32 : i32
    %1 = arith.extui %0 : i1 to i32
    %c0_i32_0 = arith.constant 0 : i32
    %2 = arith.cmpi ne, %1, %c0_i32_0 : i32
    scf.if %2 {
      %cst_13 = arith.constant 0.000000e+00 : f32
      %18 = vector.broadcast %cst_13 : f32 to vector<1x128xf32>
      %c0_14 = arith.constant 0 : index
      %c0_15 = arith.constant 0 : index
      %19 = vector.load %arg5[%c0_14, %c0_15] : memref<1x128xf32, #tpu.memory_space<vmem>>, vector<1x128xf32>
      tpu.vector_store %arg5[%c0_14, %c0_15], %18 {strides = array<i32>} : memref<1x128xf32, #tpu.memory_space<vmem>>, vector<1x128xf32>,
      %cst_16 = arith.constant 0.000000e+00 : f32
      %20 = vector.broadcast %cst_16 : f32 to vector<1x128xf32>
      %c0_17 = arith.constant 0 : index
      %c0_18 = arith.constant 0 : index
      %21 = vector.load %arg6[%c0_17, %c0_18] : memref<1x128xf32, #tpu.memory_space<vmem>>, vector<1x128xf32>
      tpu.vector_store %arg6[%c0_17, %c0_18], %20 {strides = array<i32>} : memref<1x128xf32, #tpu.memory_space<vmem>>, vector<1x128xf32>,
    } else {
    }
    %c0 = arith.constant 0 : index
    %c0_1 = arith.constant 0 : index
    %3 = vector.load %arg2[%c0, %c0_1] : memref<24x128xf32, #tpu.memory_space<vmem>>, vector<24x128xf32>
    %c0_2 = arith.constant 0 : index
    %c0_3 = arith.constant 0 : index
    %4 = vector.load %arg5[%c0_2, %c0_3] : memref<1x128xf32, #tpu.memory_space<vmem>>, vector<1x128xf32>
    %cst = arith.constant dense<0.000000e+00> : vector<128xf32>
    %5 = vector.multi_reduction <add>, %3, %cst [0] : vector<24x128xf32> to vector<128xf32>
    %6 = vector.shape_cast %5 : vector<128xf32> to vector<1x128xf32>
    %7 = arith.addf %4, %6 : vector<1x128xf32>
    %c0_4 = arith.constant 0 : index
    %c0_5 = arith.constant 0 : index
    %8 = vector.load %arg5[%c0_4, %c0_5] : memref<1x128xf32, #tpu.memory_space<vmem>>, vector<1x128xf32>
    tpu.vector_store %arg5[%c0_4, %c0_5], %7 {strides = array<i32>} : memref<1x128xf32, #tpu.memory_space<vmem>>, vector<1x128xf32>,
    %c0_6 = arith.constant 0 : index
    %c0_7 = arith.constant 0 : index
    %9 = vector.load %arg6[%c0_6, %c0_7] : memref<1x128xf32, #tpu.memory_space<vmem>>, vector<1x128xf32>
    %10 = arith.mulf %3, %3 : vector<24x128xf32>
    %cst_8 = arith.constant dense<0.000000e+00> : vector<128xf32>
    %11 = vector.multi_reduction <add>, %10, %cst_8 [0] : vector<24x128xf32> to vector<128xf32>
    %12 = vector.shape_cast %11 : vector<128xf32> to vector<1x128xf32>
    %13 = arith.addf %9, %12 : vector<1x128xf32>
    %c0_9 = arith.constant 0 : index
    %c0_10 = arith.constant 0 : index
    %14 = vector.load %arg6[%c0_9, %c0_10] : memref<1x128xf32, #tpu.memory_space<vmem>>, vector<1x128xf32>
    tpu.vector_store %arg6[%c0_9, %c0_10], %13 {strides = array<i32>} : memref<1x128xf32, #tpu.memory_space<vmem>>, vector<1x128xf32>,
    %c0_i32_11 = arith.constant 0 : i32
    %15 = arith.cmpi eq, %arg1, %c0_i32_11 : i32
    %16 = arith.extui %15 : i1 to i32
    %c0_i32_12 = arith.constant 0 : i32
    %17 = arith.cmpi ne, %16, %c0_i32_12 : i32
    scf.if %17 {
      %c0_13 = arith.constant 0 : index
      %c0_14 = arith.constant 0 : index
      %18 = vector.load %arg5[%c0_13, %c0_14] : memref<1x128xf32, #tpu.memory_space<vmem>>, vector<1x128xf32>
      %c0_15 = arith.constant 0 : index
      %c0_16 = arith.constant 0 : index
      %19 = vector.load %arg3[%c0_15, %c0_16] : memref<1x128xf32, #tpu.memory_space<vmem>>, vector<1x128xf32>
      tpu.vector_store %arg3[%c0_15, %c0_16], %18 {strides = array<i32>} : memref<1x128xf32, #tpu.memory_space<vmem>>, vector<1x128xf32>,
      %c0_17 = arith.constant 0 : index
      %c0_18 = arith.constant 0 : index
      %20 = vector.load %arg6[%c0_17, %c0_18] : memref<1x128xf32, #tpu.memory_space<vmem>>, vector<1x128xf32>
      %c0_19 = arith.constant 0 : index
      %c0_20 = arith.constant 0 : index
      %21 = vector.load %arg4[%c0_19, %c0_20] : memref<1x128xf32, #tpu.memory_space<vmem>>, vector<1x128xf32>
      tpu.vector_store %arg4[%c0_19, %c0_20], %20 {strides = array<i32>} : memref<1x128xf32, #tpu.memory_space<vmem>>, vector<1x128xf32>,
    } else {
    }
    return
  }
  func.func @transform_0(%arg0: i32, %arg1: i32) -> (i32, i32) {
    %c0_i32 = arith.constant 0 : i32
    return %arg1, %arg0 : i32, i32
  }
  func.func @transform_1(%arg0: i32, %arg1: i32) -> (i32, i32) {
    %c0_i32 = arith.constant 0 : i32
    %c0_i32_0 = arith.constant 0 : i32
    return %c0_i32, %arg0 : i32, i32
  }
  func.func @transform_2(%arg0: i32, %arg1: i32) -> (i32, i32) {
    %c0_i32 = arith.constant 0 : i32
    %c0_i32_0 = arith.constant 0 : i32
    return %c0_i32, %arg0 : i32, i32
  }
}

module attributes {stable_mosaic.version = 11 : i64} {
  func.func @_bn_norm_kernel(%arg0: i32, %arg1: i32, %arg2: memref<24x128xf32, #tpu.memory_space<vmem>>, %arg3: memref<1x128xf32, #tpu.memory_space<vmem>>, %arg4: memref<1x128xf32, #tpu.memory_space<vmem>>, %arg5: memref<24x128xbf16, #tpu.memory_space<vmem>>) attributes {dimension_semantics = [#tpu.dimension_semantics<parallel>, #tpu.dimension_semantics<parallel>], iteration_bounds = array<i64: 1, 1>, scalar_prefetch = 0 : i64, scratch_operands = 0 : i64, tpu.core_type = #tpu.core_type<tc>, window_params = [{transform_indices = @transform_0, window_bounds = array<i64: 24, 128>}, {transform_indices = @transform_1, window_bounds = array<i64: 1, 128>}, {transform_indices = @transform_2, window_bounds = array<i64: 1, 128>}, {transform_indices = @transform_3, window_bounds = array<i64: 24, 128>}]} {
    %c0 = arith.constant 0 : index
    %c0_0 = arith.constant 0 : index
    %0 = vector.load %arg2[%c0, %c0_0] : memref<24x128xf32, #tpu.memory_space<vmem>>, vector<24x128xf32>
    %c0_1 = arith.constant 0 : index
    %c0_2 = arith.constant 0 : index
    %1 = vector.load %arg3[%c0_1, %c0_2] : memref<1x128xf32, #tpu.memory_space<vmem>>, vector<1x128xf32>
    %2 = vector.broadcast %1 : vector<1x128xf32> to vector<24x128xf32>
    %3 = arith.mulf %0, %2 : vector<24x128xf32>
    %c0_3 = arith.constant 0 : index
    %c0_4 = arith.constant 0 : index
    %4 = vector.load %arg4[%c0_3, %c0_4] : memref<1x128xf32, #tpu.memory_space<vmem>>, vector<1x128xf32>
    %5 = vector.broadcast %4 : vector<1x128xf32> to vector<24x128xf32>
    %6 = arith.addf %3, %5 : vector<24x128xf32>
    %cst = arith.constant 0.000000e+00 : f32
    %7 = vector.broadcast %cst : f32 to vector<24x128xf32>
    %8 = arith.cmpf ogt, %6, %7 : vector<24x128xf32>
    %cst_5 = arith.constant 2.000000e-01 : f32
    %9 = vector.broadcast %cst_5 : f32 to vector<24x128xf32>
    %10 = arith.mulf %9, %6 : vector<24x128xf32>
    %11 = arith.select %8, %6, %10 : vector<24x128xi1>, vector<24x128xf32>
    %12 = arith.truncf %11 : vector<24x128xf32> to vector<24x128xbf16>
    %c0_6 = arith.constant 0 : index
    %c0_7 = arith.constant 0 : index
    %13 = vector.load %arg5[%c0_6, %c0_7] : memref<24x128xbf16, #tpu.memory_space<vmem>>, vector<24x128xbf16>
    tpu.vector_store %arg5[%c0_6, %c0_7], %12 {strides = array<i32>} : memref<24x128xbf16, #tpu.memory_space<vmem>>, vector<24x128xbf16>,
    return
  }
  func.func @transform_0(%arg0: i32, %arg1: i32) -> (i32, i32) {
    %c0_i32 = arith.constant 0 : i32
    return %arg0, %arg1 : i32, i32
  }
  func.func @transform_1(%arg0: i32, %arg1: i32) -> (i32, i32) {
    %c0_i32 = arith.constant 0 : i32
    %c0_i32_0 = arith.constant 0 : i32
    return %c0_i32, %arg1 : i32, i32
  }
  func.func @transform_2(%arg0: i32, %arg1: i32) -> (i32, i32) {
    %c0_i32 = arith.constant 0 : i32
    %c0_i32_0 = arith.constant 0 : i32
    return %c0_i32, %arg1 : i32, i32
  }
  func.func @transform_3(%arg0: i32, %arg1: i32) -> (i32, i32) {
    %c0_i32 = arith.constant 0 : i32
    return %arg0, %arg1 : i32, i32
  }
}

module attributes {stable_mosaic.version = 11 : i64} {
  func.func @_gemm_kernel(%arg0: i32, %arg1: i32, %arg2: i32, %arg3: memref<8x512xbf16, #tpu.memory_space<vmem>>, %arg4: memref<512x128xbf16, #tpu.memory_space<vmem>>, %arg5: memref<1x128xf32, #tpu.memory_space<vmem>>, %arg6: memref<8x128xf32, #tpu.memory_space<vmem>>, %arg7: memref<8x128xf32, #tpu.memory_space<vmem>>) attributes {dimension_semantics = [#tpu.dimension_semantics<parallel>, #tpu.dimension_semantics<parallel>, #tpu.dimension_semantics<arbitrary>], iteration_bounds = array<i64: 1, 1, 2>, scalar_prefetch = 0 : i64, scratch_operands = 1 : i64, tpu.core_type = #tpu.core_type<tc>, window_params = [{transform_indices = @transform_0, window_bounds = array<i64: 8, 512>}, {transform_indices = @transform_1, window_bounds = array<i64: 512, 128>}, {transform_indices = @transform_2, window_bounds = array<i64: 1, 128>}, {transform_indices = @transform_3, window_bounds = array<i64: 8, 128>}]} {
    %c0_i32 = arith.constant 0 : i32
    %0 = arith.cmpi eq, %arg2, %c0_i32 : i32
    %1 = arith.extui %0 : i1 to i32
    %c0_i32_0 = arith.constant 0 : i32
    %2 = arith.cmpi ne, %1, %c0_i32_0 : i32
    scf.if %2 {
      %cst_9 = arith.constant 0.000000e+00 : f32
      %12 = vector.broadcast %cst_9 : f32 to vector<8x128xf32>
      %c0_10 = arith.constant 0 : index
      %c0_11 = arith.constant 0 : index
      %13 = vector.load %arg7[%c0_10, %c0_11] : memref<8x128xf32, #tpu.memory_space<vmem>>, vector<8x128xf32>
      tpu.vector_store %arg7[%c0_10, %c0_11], %12 {strides = array<i32>} : memref<8x128xf32, #tpu.memory_space<vmem>>, vector<8x128xf32>,
    } else {
    }
    %c0 = arith.constant 0 : index
    %c0_1 = arith.constant 0 : index
    %3 = vector.load %arg7[%c0, %c0_1] : memref<8x128xf32, #tpu.memory_space<vmem>>, vector<8x128xf32>
    %c0_2 = arith.constant 0 : index
    %c0_3 = arith.constant 0 : index
    %4 = vector.load %arg3[%c0_2, %c0_3] : memref<8x512xbf16, #tpu.memory_space<vmem>>, vector<8x512xbf16>
    %c0_4 = arith.constant 0 : index
    %c0_5 = arith.constant 0 : index
    %5 = vector.load %arg4[%c0_4, %c0_5] : memref<512x128xbf16, #tpu.memory_space<vmem>>, vector<512x128xbf16>
    %cst = arith.constant dense<0.000000e+00> : vector<8x128xf32>
    %6 = tpu.matmul %4, %5, %cst {dimension_numbers = #tpu.dot_dimension_numbers<[1], [0], [0], [1], [0, 0, 1, 1], [], []>} : vector<8x512xbf16>, vector<512x128xbf16>, vector<8x128xf32> -> vector<8x128xf32>
    %7 = arith.addf %3, %6 : vector<8x128xf32>
    %c0_6 = arith.constant 0 : index
    %c0_7 = arith.constant 0 : index
    %8 = vector.load %arg7[%c0_6, %c0_7] : memref<8x128xf32, #tpu.memory_space<vmem>>, vector<8x128xf32>
    tpu.vector_store %arg7[%c0_6, %c0_7], %7 {strides = array<i32>} : memref<8x128xf32, #tpu.memory_space<vmem>>, vector<8x128xf32>,
    %c1_i32 = arith.constant 1 : i32
    %9 = arith.cmpi eq, %arg2, %c1_i32 : i32
    %10 = arith.extui %9 : i1 to i32
    %c0_i32_8 = arith.constant 0 : i32
    %11 = arith.cmpi ne, %10, %c0_i32_8 : i32
    scf.if %11 {
      %c0_9 = arith.constant 0 : index
      %c0_10 = arith.constant 0 : index
      %12 = vector.load %arg7[%c0_9, %c0_10] : memref<8x128xf32, #tpu.memory_space<vmem>>, vector<8x128xf32>
      %c0_11 = arith.constant 0 : index
      %c0_12 = arith.constant 0 : index
      %13 = vector.load %arg5[%c0_11, %c0_12] : memref<1x128xf32, #tpu.memory_space<vmem>>, vector<1x128xf32>
      %14 = vector.broadcast %13 : vector<1x128xf32> to vector<8x128xf32>
      %15 = arith.addf %12, %14 : vector<8x128xf32>
      %c0_13 = arith.constant 0 : index
      %c0_14 = arith.constant 0 : index
      %16 = vector.load %arg6[%c0_13, %c0_14] : memref<8x128xf32, #tpu.memory_space<vmem>>, vector<8x128xf32>
      tpu.vector_store %arg6[%c0_13, %c0_14], %15 {strides = array<i32>} : memref<8x128xf32, #tpu.memory_space<vmem>>, vector<8x128xf32>,
    } else {
    }
    return
  }
  func.func @transform_0(%arg0: i32, %arg1: i32, %arg2: i32) -> (i32, i32) {
    %c0_i32 = arith.constant 0 : i32
    return %arg0, %arg2 : i32, i32
  }
  func.func @transform_1(%arg0: i32, %arg1: i32, %arg2: i32) -> (i32, i32) {
    %c0_i32 = arith.constant 0 : i32
    return %arg2, %arg1 : i32, i32
  }
  func.func @transform_2(%arg0: i32, %arg1: i32, %arg2: i32) -> (i32, i32) {
    %c0_i32 = arith.constant 0 : i32
    %c0_i32_0 = arith.constant 0 : i32
    return %c0_i32, %arg1 : i32, i32
  }
  func.func @transform_3(%arg0: i32, %arg1: i32, %arg2: i32) -> (i32, i32) {
    %c0_i32 = arith.constant 0 : i32
    return %arg0, %arg1 : i32, i32
  }
}

</mosaic_0001>

<bundles_post_ra>
// kernel: _lambda_.11
= control target key start
LH: loop header
LB: loop body
LE: loop exit
PB: predicated region body
PF: predicated region fallthrough
CT: control target
= control target key end

     0   :  { %s1552_s12 = smov 0   ;;  %s1554_s13 = smov 0   ;;  %s1699_s0 = inlined_call_operand.vmem [shape: bf16[512,64], index: 0, kind: input, shape index: {}]   ;;  %s1700_s1 = inlined_call_operand.vmem [shape: bf16[64,128], index: 1, kind: input, shape index: {}]   ;;  %s1701_s2 = inlined_call_operand.vmem [shape: f32[1,128], index: 2, kind: input, shape index: {}]   ;;  %s1702_s3 = inlined_call_operand.vmem [shape: bf16[512,128], index: 3, kind: output, shape index: {}]  }
   0x1   :  { %s1556_s14 = smov 0  }
   0x2 LB: > { %s32_s15 = sadd.s32 1, %s1526_s13  ;;  %p1193_p0 = scmp.ge.s32.totalorder %s1530_s14, 1  ;;  %s1530_s14 = sphi %s1556_s14, %s13_s14   ;;  %s1526_s13 = sphi %s1554_s13, %s1704_s13   ;;  %s1522_s12 = sphi %s1552_s12, %s1703_s12  }
   0x3   : > { %p34_p1 = scmp.ge.s32.totalorder %s32_s15, 2  ;;  %p188_p2 = scmp.lt.s32.totalorder %s1530_s14, 3 }
   0x5   : > { %s1706_s15 = smov (%p34_p1, %s32_s15), 0  ;;  %p189_p3 = pnand %p1193_p0, %p188_p2 }
   0x6   : > { %v1488_v0 = vld [vmem:[%s1700_s1] sm:$0xff] (!%p189_p3)   ;;  %s1194_s18 = sshll.u32 (!%p189_p3), %s1522_s12, 5  ;;  %v1489_v1 = vld [vmem:[%s1700_s1 + $0x8] sm:$0xff] (!%p189_p3)   ;;  %v1490_v2 = vld [vmem:[%s1700_s1 + $0x10] sm:$0xff] (!%p189_p3)   ;;  %vm472_vm0 = vcmask (!%p189_p3), 523264  }
   0x7   : > { %192 = sbr.rel (%p189_p3) target bundleno = 278 (0x116), region = 32  ;;  %p230_p4 = scmp.lt.s32.totalorder (!%p189_p3), %s1194_s18, 63  ;;  %1416 = vmatprep.subr.bf16.mxu0 (!%p189_p3), %v1488_v0  ;;  %1456 = vmatprep.subr.bf16.mxu1 (!%p189_p3), %v1488_v0  ;;  %v1491_v3 = vld [vmem:[%s1700_s1 + $0x18] sm:$0xff] (!%p189_p3)   ;;  %v1627_v20 = vld [vmem:[%s1701_s2] ss:$0 sm:$0xff] (!%p189_p3) }
   0x8   : > { %1417 = vmatpush3.bf16.msra.mxu0 (!%p189_p3), %v1488_v0  ;;  %1460 = vmatpush3.bf16.msra.mxu1 (!%p189_p3), %v1488_v0 }
   0x9   : > { %1418 = vmatprep.subr.bf16.mxu0 (!%p189_p3), %v1489_v1  ;;  %1457 = vmatprep.subr.bf16.mxu1 (!%p189_p3), %v1489_v1 }
   0xc   : > { %1419 = vmatpush3.bf16.msra.mxu0 (!%p189_p3), %v1489_v1  ;;  %1461 = vmatpush3.bf16.msra.mxu1 (!%p189_p3), %v1489_v1 }
   0xd   : > { %1420 = vmatprep.subr.bf16.mxu0 (!%p189_p3), %v1490_v2  ;;  %1458 = vmatprep.subr.bf16.mxu1 (!%p189_p3), %v1490_v2 }
   0xe   : > { %s1708_s18 = smov (!%p230_p4, %s1194_s18), 63 }
   0xf   : > { %s1195_s23 = sshll.u32 %s1708_s18, 2 }
  0x10   : > { %s1590_s28 = scalar_lea.vmem %s1699_s0, %s1195_s23  ;;  %1421 = vmatpush3.bf16.msra.mxu0 %v1490_v2  ;;  %1462 = vmatpush3.bf16.msra.mxu1 %v1490_v2  ;;  %s1644_s6 = scalar_lea.vmem %s1702_s3, %s1195_s23 }
  0x11   : > { %v1492_v4 = vld [vmem:[%s1590_s28] sm:$0xff]   ;;  %1422 = vmatprep.subr.bf16.mxu0 %v1491_v3  ;;  %1459 = vmatprep.subr.bf16.mxu1 %v1491_v3  ;;  %v1494_v6 = vld [vmem:[%s1590_s28 + $0x8] sm:$0xff]   ;;  %v1496_v8 = vld [vmem:[%s1590_s28 + $0x10] sm:$0xff]  }
  0x12   : > { %v1493_v5 = vld [vmem:[%s1590_s28 + $0x40] sm:$0xff]   ;;  %1424 = vmatprep.mubr.msk.bf16.mxu0 %vm472_vm0, %v1492_v4  ;;  %v1495_v7 = vld [vmem:[%s1590_s28 + $0x48] sm:$0xff]   ;;  %v1497_v9 = vld [vmem:[%s1590_s28 + $0x50] sm:$0xff]  }
  0x13   : > { %1440 = vmatprep.mubr.msk.bf16.mxu1 %vm472_vm0, %v1493_v5  ;;  %v1498_v10 = vld [vmem:[%s1590_s28 + $0x18] sm:$0xff]   ;;  %v1500_v12 = vld [vmem:[%s1590_s28 + $0x20] sm:$0xff]   ;;  %v1502_v14 = vld [vmem:[%s1590_s28 + $0x28] sm:$0xff]  }
  0x14   : > { %1423 = vmatpush3.bf16.msra.mxu0 %v1491_v3  ;;  %1463 = vmatpush3.bf16.msra.mxu1 %v1491_v3  ;;  %v1499_v11 = vld [vmem:[%s1590_s28 + $0x58] sm:$0xff]   ;;  %v1501_v13 = vld [vmem:[%s1590_s28 + $0x60] sm:$0xff]   ;;  %v1503_v15 = vld [vmem:[%s1590_s28 + $0x68] sm:$0xff]  }
  0x15   : > { %v1504_v16 = vld [vmem:[%s1590_s28 + $0x30] sm:$0xff]   ;;  %v1506_v18 = vld [vmem:[%s1590_s28 + $0x38] sm:$0xff]  }
  0x16   : > { %v1505_v17 = vld [vmem:[%s1590_s28 + $0x70] sm:$0xff]   ;;  %v1507_v19 = vld [vmem:[%s1590_s28 + $0x78] sm:$0xff]  }
  0x17   : > { %1425 = vmatmul.mubr.msk.bf16.vlgmr.msra.gmra.mrb[0].mxu0 %vm472_vm0, %v1494_v6  ;;  %1441 = vmatmul.mubr.msk.bf16.vlgmr.msra.gmra.mrb[0].mxu1 %vm472_vm0, %v1495_v7 }
  0x18   : > { %1428 = vmatprep.mubr.msk.bf16.mxu0 %vm472_vm0, %v1496_v8  ;;  %1444 = vmatprep.mubr.msk.bf16.mxu1 %vm472_vm0, %v1497_v9 }
  0x1f   : > { %1429 = vmatmul.mubr.msk.bf16.gmra.mrb[4].mxu0 %vm472_vm0, %v1498_v10  ;;  %1445 = vmatmul.mubr.msk.bf16.gmra.mrb[4].mxu1 %vm472_vm0, %v1499_v11 }
  0x20   : > { %1432 = vmatprep.mubr.msk.bf16.mxu0 %vm472_vm0, %v1500_v12  ;;  %1448 = vmatprep.mubr.msk.bf16.mxu1 %vm472_vm0, %v1501_v13 }
  0x27   : > { %1433 = vmatmul.mubr.msk.bf16.gmra.mrb[8].mxu0 %vm472_vm0, %v1502_v14  ;;  %1449 = vmatmul.mubr.msk.bf16.gmra.mrb[8].mxu1 %vm472_vm0, %v1503_v15 }
  0x28   : > { %1436 = vmatprep.mubr.msk.bf16.mxu0 %vm472_vm0, %v1504_v16  ;;  %1452 = vmatprep.mubr.msk.bf16.mxu1 %vm472_vm0, %v1505_v17 }
  0x2f   : > { %1437 = vmatmul.mubr.msk.bf16.gmra.mrb[12].mxu0 %vm472_vm0, %v1506_v18  ;;  %1453 = vmatmul.mubr.msk.bf16.gmra.mrb[12].mxu1 %vm472_vm0, %v1507_v19 }
  0xea   : > { %v1426_v21 = vpop.f32.mrb[0].mxu0  ;;  %v1442_v22 = vpop.f32.mrb[0].mxu1 }
  0xeb   : > { %v790_v23 = vadd.f32 %v1426_v21, %v1627_v20  ;;  %v806_v24 = vadd.f32 %v1442_v22, %v1627_v20  ;;  %v555_v25 = vpop.f32.mrb[1].mxu0  ;;  %v619_v26 = vpop.f32.mrb[1].mxu1 }
  0xec   : > { %v788_v27 = vadd.f32 %v1627_v20, %v555_v25  ;;  %v804_v28 = vadd.f32 %v1627_v20, %v619_v26  ;;  %v1427_v29 = vpop.f32.mrb[2].mxu0  ;;  %v1443_v30 = vpop.f32.mrb[2].mxu1 }
  0xed   : > { %vm822_vm1 = vcmp.gt.f32.partialorder %v790_v23, 0.0  ;;  %v854_v31 = vmul.f32 0.2, %v790_v23  ;;  %vm838_vm2 = vcmp.gt.f32.partialorder %v806_v24, 0.0  ;;  %v870_v32 = vmul.f32 0.2, %v806_v24 }
  0xee   : > { %vm820_vm3 = vcmp.gt.f32.partialorder %v788_v27, 0.0  ;;  %v852_v33 = vmul.f32 0.2, %v788_v27  ;;  %vm836_vm4 = vcmp.gt.f32.partialorder %v804_v28, 0.0  ;;  %v868_v34 = vmul.f32 0.2, %v804_v28 }
  0xef   : > { %v791_v35 = vadd.f32 %v1427_v29, %v1627_v20  ;;  %v807_v36 = vadd.f32 %v1443_v30, %v1627_v20  ;;  %v558_v37 = vpop.f32.mrb[3].mxu0  ;;  %v622_v38 = vpop.f32.mrb[3].mxu1  ;;  %v886_v39 = vsel %vm822_vm1, %v790_v23, %v854_v31  ;;  %v902_v40 = vsel %vm838_vm2, %v806_v24, %v870_v32 }
  0xf0   : > { %v789_v41 = vadd.f32 %v1627_v20, %v558_v37  ;;  %v805_v42 = vadd.f32 %v1627_v20, %v622_v38  ;;  %v884_v47 = vsel %vm820_vm3, %v788_v27, %v852_v33  ;;  %v900_v48 = vsel %vm836_vm4, %v804_v28, %v868_v34 }
  0xf1   : > { %vm823_vm5 = vcmp.gt.f32.partialorder %v791_v35, 0.0  ;;  %v855_v43 = vmul.f32 0.2, %v791_v35  ;;  %vm839_vm6 = vcmp.gt.f32.partialorder %v807_v36, 0.0  ;;  %v871_v44 = vmul.f32 0.2, %v807_v36 }
  0xf2   : > { %vm821_vm7 = vcmp.gt.f32.partialorder %v789_v41, 0.0  ;;  %v853_v45 = vmul.f32 0.2, %v789_v41  ;;  %vm837_vm8 = vcmp.gt.f32.partialorder %v805_v42, 0.0  ;;  %v869_v46 = vmul.f32 0.2, %v805_v42 }
  0xf3   : > { %v887_v49 = vsel %vm823_vm5, %v791_v35, %v855_v43  ;;  %v903_v50 = vsel %vm839_vm6, %v807_v36, %v871_v44  ;;  %v1430_v51 = vpop.f32.mrb[4].mxu0  ;;  %v1446_v52 = vpop.f32.mrb[4].mxu1 }
  0xf4   : > { %v1309_v53 = vpack.c.bf16 %v887_v49, %v886_v39  ;;  %v1349_v54 = vpack.c.bf16 %v903_v50, %v902_v40  ;;  %v885_v55 = vsel %vm821_vm7, %v789_v41, %v853_v45  ;;  %v901_v56 = vsel %vm837_vm8, %v805_v42, %v869_v46  ;;  %v571_v57 = vpop.f32.mrb[5].mxu0  ;;  %v635_v58 = vpop.f32.mrb[5].mxu1 }
  0xf5   : > { %v1304_v59 = vpack.c.bf16 %v885_v55, %v884_v47  ;;  %v1344_v60 = vpack.c.bf16 %v901_v56, %v900_v48  ;;  %v794_v61 = vadd.f32 %v1430_v51, %v1627_v20  ;;  %v810_v62 = vadd.f32 %v1446_v52, %v1627_v20  ;;  %v1431_v63 = vpop.f32.mrb[6].mxu0  ;;  %v1447_v0 = vpop.f32.mrb[6].mxu1 }
  0xf6   : > { %1381 = vst [vmem:[%s1644_s6 + $0x8] sm:$0xff] %v1309_v53   ;;  %1389 = vst [vmem:[%s1644_s6 + $0x48] sm:$0xff] %v1349_v54   ;;  %v792_v1 = vadd.f32 %v1627_v20, %v571_v57  ;;  %v808_v2 = vadd.f32 %v1627_v20, %v635_v58  ;;  %v795_v3 = vadd.f32 %v1431_v63, %v1627_v20  ;;  %v574_v5 = vpop.f32.mrb[7].mxu0  ;;  %v638_v6 = vpop.f32.mrb[7].mxu1 }
  0xf7   : > { %v811_v4 = vadd.f32 %v1447_v0, %v1627_v20  ;;  %1305 = vst [vmem:[%s1644_s6] sm:$0xff] %v1304_v59   ;;  %1388 = vst [vmem:[%s1644_s6 + $0x40] sm:$0xff] %v1344_v60   ;;  %vm826_vm9 = vcmp.gt.f32.partialorder %v794_v61, 0.0  ;;  %v858_v7 = vmul.f32 0.2, %v794_v61  ;;  %vm842_vm10 = vcmp.gt.f32.partialorder %v810_v62, 0.0 }
  0xf8   : > { %v874_v8 = vmul.f32 0.2, %v810_v62  ;;  %vm824_vm11 = vcmp.gt.f32.partialorder %v792_v1, 0.0  ;;  %v856_v9 = vmul.f32 0.2, %v792_v1  ;;  %vm840_vm12 = vcmp.gt.f32.partialorder %v808_v2, 0.0 }
  0xf9   : > { %v890_v10 = vsel %vm826_vm9, %v794_v61, %v858_v7  ;;  %v872_v11 = vmul.f32 0.2, %v808_v2  ;;  %vm827_vm13 = vcmp.gt.f32.partialorder %v795_v3, 0.0  ;;  %v859_v12 = vmul.f32 0.2, %v795_v3 }
  0xfa   : > { %v906_v13 = vsel %vm842_vm10, %v810_v62, %v874_v8  ;;  %v888_v14 = vsel %vm824_vm11, %v792_v1, %v856_v9  ;;  %vm843_vm14 = vcmp.gt.f32.partialorder %v811_v4, 0.0  ;;  %v875_v15 = vmul.f32 0.2, %v811_v4  ;;  %v1434_v16 = vpop.f32.mrb[8].mxu0  ;;  %v1450_v17 = vpop.f32.mrb[8].mxu1 }
  0xfb   : > { %v891_v18 = vsel %vm827_vm13, %v795_v3, %v859_v12  ;;  %v793_v19 = vadd.f32 %v1627_v20, %v574_v5  ;;  %v809_v21 = vadd.f32 %v1627_v20, %v638_v6  ;;  %v798_v22 = vadd.f32 %v1434_v16, %v1627_v20  ;;  %v587_v23 = vpop.f32.mrb[9].mxu0  ;;  %v651_v24 = vpop.f32.mrb[9].mxu1 }
  0xfc   : > { %v1319_v25 = vpack.c.bf16 %v891_v18, %v890_v10  ;;  %v907_v26 = vsel %vm843_vm14, %v811_v4, %v875_v15  ;;  %v814_v27 = vadd.f32 %v1450_v17, %v1627_v20  ;;  %v796_v28 = vadd.f32 %v1627_v20, %v587_v23  ;;  %v1435_v29 = vpop.f32.mrb[10].mxu0  ;;  %v1451_v30 = vpop.f32.mrb[10].mxu1 }
  0xfd   : > { %v1359_v31 = vpack.c.bf16 %v907_v26, %v906_v13  ;;  %vm825_vm15 = vcmp.gt.f32.partialorder %v793_v19, 0.0  ;;  %v857_v32 = vmul.f32 0.2, %v793_v19  ;;  %vm841_vm0 = vcmp.gt.f32.partialorder %v809_v21, 0.0  ;;  %v590_v33 = vpop.f32.mrb[11].mxu0  ;;  %v654_v34 = vpop.f32.mrb[11].mxu1 }
  0xfe   : > { %1383 = vst [vmem:[%s1644_s6 + $0x18] sm:$0xff] %v1319_v25   ;;  %v873_v35 = vmul.f32 0.2, %v809_v21  ;;  %vm830_vm1 = vcmp.gt.f32.partialorder %v798_v22, 0.0  ;;  %v862_v36 = vmul.f32 0.2, %v798_v22  ;;  %v904_v37 = vsel %vm840_vm12, %v808_v2, %v872_v11 }
  0xff   : > { %vm846_vm2 = vcmp.gt.f32.partialorder %v814_v27, 0.0  ;;  %1391 = vst [vmem:[%s1644_s6 + $0x58] sm:$0xff] %v1359_v31   ;;  %v889_v38 = vsel %vm825_vm15, %v793_v19, %v857_v32  ;;  %v878_v39 = vmul.f32 0.2, %v814_v27  ;;  %vm828_vm3 = vcmp.gt.f32.partialorder %v796_v28, 0.0 }
 0x100   : > { %v1314_v40 = vpack.c.bf16 %v889_v38, %v888_v14  ;;  %v905_v41 = vsel %vm841_vm0, %v809_v21, %v873_v35  ;;  %v860_v42 = vmul.f32 0.2, %v796_v28  ;;  %v812_v43 = vadd.f32 %v1627_v20, %v651_v24 }
 0x101   : > { %v1354_v44 = vpack.c.bf16 %v905_v41, %v904_v37  ;;  %v894_v45 = vsel %vm830_vm1, %v798_v22, %v862_v36  ;;  %v910_v46 = vsel %vm846_vm2, %v814_v27, %v878_v39  ;;  %v799_v47 = vadd.f32 %v1435_v29, %v1627_v20 }
 0x102   : > { %1382 = vst [vmem:[%s1644_s6 + $0x10] sm:$0xff] %v1314_v40   ;;  %vm844_vm4 = vcmp.gt.f32.partialorder %v812_v43, 0.0  ;;  %v876_v48 = vmul.f32 0.2, %v812_v43  ;;  %v815_v49 = vadd.f32 %v1451_v30, %v1627_v20  ;;  %v797_v50 = vadd.f32 %v1627_v20, %v590_v33  ;;  %v1438_v51 = vpop.f32.mrb[12].mxu0  ;;  %v1454_v52 = vpop.f32.mrb[12].mxu1 }
 0x103   : > { %1390 = vst [vmem:[%s1644_s6 + $0x50] sm:$0xff] %v1354_v44   ;;  %vm831_vm5 = vcmp.gt.f32.partialorder %v799_v47, 0.0  ;;  %v863_v53 = vmul.f32 0.2, %v799_v47  ;;  %v813_v54 = vadd.f32 %v1627_v20, %v654_v34  ;;  %v802_v55 = vadd.f32 %v1438_v51, %v1627_v20  ;;  %v603_v56 = vpop.f32.mrb[13].mxu0  ;;  %v667_v57 = vpop.f32.mrb[13].mxu1 }
 0x104   : > { %v892_v58 = vsel %vm828_vm3, %v796_v28, %v860_v42  ;;  %vm847_vm6 = vcmp.gt.f32.partialorder %v815_v49, 0.0  ;;  %v879_v59 = vmul.f32 0.2, %v815_v49  ;;  %vm829_vm7 = vcmp.gt.f32.partialorder %v797_v50, 0.0  ;;  %v1439_v60 = vpop.f32.mrb[14].mxu0  ;;  %v1455_v61 = vpop.f32.mrb[14].mxu1 }
 0x105   : > { %v895_v62 = vsel %vm831_vm5, %v799_v47, %v863_v53  ;;  %v861_v63 = vmul.f32 0.2, %v797_v50  ;;  %vm845_vm8 = vcmp.gt.f32.partialorder %v813_v54, 0.0  ;;  %v877_v0 = vmul.f32 0.2, %v813_v54  ;;  %v606_v1 = vpop.f32.mrb[15].mxu0 }
 0x106   : > { %v908_v2 = vsel %vm844_vm4, %v812_v43, %v876_v48  ;;  %v1329_v3 = vpack.c.bf16 %v895_v62, %v894_v45  ;;  %v911_v4 = vsel %vm847_vm6, %v815_v49, %v879_v59  ;;  %v866_v5 = vmul.f32 0.2, %v802_v55  ;;  %v670_v6 = vpop.f32.mrb[15].mxu1 }
 0x107   : > { %v1369_v7 = vpack.c.bf16 %v911_v4, %v910_v46  ;;  %v893_v8 = vsel %vm829_vm7, %v797_v50, %v861_v63  ;;  %v909_v9 = vsel %vm845_vm8, %v813_v54, %v877_v0  ;;  %v818_v10 = vadd.f32 %v1454_v52, %v1627_v20 }
 0x108   : > { %1385 = vst [vmem:[%s1644_s6 + $0x28] sm:$0xff] %v1329_v3   ;;  %v1324_v11 = vpack.c.bf16 %v893_v8, %v892_v58  ;;  %v1364_v12 = vpack.c.bf16 %v909_v9, %v908_v2  ;;  %vm834_vm9 = vcmp.gt.f32.partialorder %v802_v55, 0.0  ;;  %v800_v13 = vadd.f32 %v1627_v20, %v603_v56 }
 0x109   : > { %1393 = vst [vmem:[%s1644_s6 + $0x68] sm:$0xff] %v1369_v7   ;;  %vm850_vm10 = vcmp.gt.f32.partialorder %v818_v10, 0.0  ;;  %v882_v14 = vmul.f32 0.2, %v818_v10  ;;  %v816_v15 = vadd.f32 %v1627_v20, %v667_v57  ;;  %v803_v16 = vadd.f32 %v1439_v60, %v1627_v20 }
 0x10a   : > { %1384 = vst [vmem:[%s1644_s6 + $0x20] sm:$0xff] %v1324_v11   ;;  %1392 = vst [vmem:[%s1644_s6 + $0x60] sm:$0xff] %v1364_v12   ;;  %v864_v17 = vmul.f32 0.2, %v800_v13  ;;  %v819_v18 = vadd.f32 %v1455_v61, %v1627_v20  ;;  %v801_v19 = vadd.f32 %v1627_v20, %v606_v1  ;;  %v898_v21 = vsel %vm834_vm9, %v802_v55, %v866_v5 }
 0x10b   : > { %vm832_vm11 = vcmp.gt.f32.partialorder %v800_v13, 0.0  ;;  %vm835_vm12 = vcmp.gt.f32.partialorder %v803_v16, 0.0  ;;  %v914_v22 = vsel %vm850_vm10, %v818_v10, %v882_v14  ;;  %v867_v23 = vmul.f32 0.2, %v803_v16 }
 0x10c   : > { %vm851_vm13 = vcmp.gt.f32.partialorder %v819_v18, 0.0  ;;  %v883_v24 = vmul.f32 0.2, %v819_v18  ;;  %vm848_vm14 = vcmp.gt.f32.partialorder %v816_v15, 0.0  ;;  %vm833_vm15 = vcmp.gt.f32.partialorder %v801_v19, 0.0 }
 0x10d   : > { %v865_v25 = vmul.f32 0.2, %v801_v19  ;;  %v817_v26 = vadd.f32 %v1627_v20, %v670_v6  ;;  %v896_v27 = vsel %vm832_vm11, %v800_v13, %v864_v17  ;;  %v880_v28 = vmul.f32 0.2, %v816_v15 }
 0x10e   : > { %v899_v29 = vsel %vm835_vm12, %v803_v16, %v867_v23  ;;  %v915_v30 = vsel %vm851_vm13, %v819_v18, %v883_v24 }
 0x10f   : > { %v1339_v31 = vpack.c.bf16 %v899_v29, %v898_v21  ;;  %v1379_v32 = vpack.c.bf16 %v915_v30, %v914_v22  ;;  %v897_v33 = vsel %vm833_vm15, %v801_v19, %v865_v25  ;;  %vm849_vm0 = vcmp.gt.f32.partialorder %v817_v26, 0.0 }
 0x110   : > { %v1334_v34 = vpack.c.bf16 %v897_v33, %v896_v27  ;;  %v881_v35 = vmul.f32 0.2, %v817_v26  ;;  %v912_v36 = vsel %vm848_vm14, %v816_v15, %v880_v28 }
 0x111   : > { %1387 = vst [vmem:[%s1644_s6 + $0x38] sm:$0xff] %v1339_v31   ;;  %1395 = vst [vmem:[%s1644_s6 + $0x78] sm:$0xff] %v1379_v32  }
 0x112   : > { %1386 = vst [vmem:[%s1644_s6 + $0x30] sm:$0xff] %v1334_v34   ;;  %v913_v37 = vsel %vm849_vm0, %v817_v26, %v881_v35 }
 0x113   : > { %v1374_v38 = vpack.c.bf16 %v913_v37, %v912_v36 }
 0x115   : > { %1394 = vst [vmem:[%s1644_s6 + $0x70] sm:$0xff] %v1374_v38  }
 0x116 PF: > { %s13_s14 = sadd.s32 1, %s1530_s14   ;;  %s1703_s12 = smov %s1526_s13 }
 0x117   : > { %p10_p5 = scmp.ge.s32.totalorder %s13_s14, 4   ;;  %s1704_s13 = smov %s1706_s15 }
 0x119   :  { %12 = sbr.rel (!%p10_p5) target bundleno = 2 (0x2), region = 76 }

// kernel: _lambda_.12
= control target key start
LH: loop header
LB: loop body
LE: loop exit
PB: predicated region body
PF: predicated region fallthrough
CT: control target
= control target key end

     0   :  { %s751_s1 = inlined_call_operand.vmem [shape: bf16[256,128], index: 1, kind: input, shape index: {}]   ;;  %s752_s0 = inlined_call_operand.vmem [shape: bf16[128,256], index: 0, kind: input, shape index: {}]   ;;  %s753_s2 = inlined_call_operand.vmem [shape: f32[128,128], index: 2, kind: output, shape index: {}]  }
   0x1   :  { %v552_v0 = vld [vmem:[%s751_s1 + $0x40] sm:$0xff]   ;;  %v554_v2 = vld [vmem:[%s751_s1 + $0x48] sm:$0xff]   ;;  %v556_v4 = vld [vmem:[%s751_s1 + $0x50] sm:$0xff]  }
   0x2   :  { %v553_v1 = vld [vmem:[%s751_s1] sm:$0xff]   ;;  %472 = vmatprep.subr.bf16.mxu0 %v552_v0  ;;  %536 = vmatprep.subr.bf16.mxu1 %v552_v0  ;;  %v555_v3 = vld [vmem:[%s751_s1 + $0x8] sm:$0xff]   ;;  %v557_v5 = vld [vmem:[%s751_s1 + $0x10] sm:$0xff]  }
   0x3   :  { %473 = vmatpush3.bf16.msra.mxu0 %v553_v1  ;;  %544 = vmatpush3.bf16.msra.mxu1 %v553_v1  ;;  %v558_v6 = vld [vmem:[%s751_s1 + $0x58] sm:$0xff]   ;;  %v560_v8 = vld [vmem:[%s751_s1 + $0x60] sm:$0xff]   ;;  %v562_v10 = vld [vmem:[%s751_s1 + $0x68] sm:$0xff]  }
   0x4   :  { %474 = vmatprep.subr.bf16.mxu0 %v554_v2  ;;  %537 = vmatprep.subr.bf16.mxu1 %v554_v2  ;;  %v559_v7 = vld [vmem:[%s751_s1 + $0x18] sm:$0xff]   ;;  %v561_v9 = vld [vmem:[%s751_s1 + $0x20] sm:$0xff]   ;;  %v563_v13 = vld [vmem:[%s751_s1 + $0x28] sm:$0xff]  }
   0x5   :  { %v570_v11 = vld [vmem:[%s752_s0 + $0x4] ss:$8 sps:$4 sm:$0xff]   ;;  %v564_v14 = vld [vmem:[%s751_s1 + $0x70] sm:$0xff]   ;;  %v566_v16 = vld [vmem:[%s751_s1 + $0x78] sm:$0xff]  }
   0x6   :  { %v573_v12 = vld [vmem:[%s752_s0 + $0x44] ss:$8 sps:$4 sm:$0xff]   ;;  %304 = vmatprep.mubr.bf16.mxu0 %v570_v11  ;;  %v565_v15 = vld [vmem:[%s751_s1 + $0x30] sm:$0xff]   ;;  %v567_v17 = vld [vmem:[%s751_s1 + $0x38] sm:$0xff]  }
   0x7   :  { %475 = vmatpush3.bf16.msra.mxu0 %v555_v3  ;;  %545 = vmatpush3.bf16.msra.mxu1 %v555_v3  ;;  %v568_v18 = vld [vmem:[%s752_s0] ss:$8 sps:$4 sm:$0xff]   ;;  %v574_v20 = vld [vmem:[%s752_s0 + $0x14] ss:$8 sps:$4 sm:$0xff]   ;;  %v578_v22 = vld [vmem:[%s752_s0 + $0x10] ss:$8 sps:$4 sm:$0xff]  }
   0x8   :  { %476 = vmatprep.subr.bf16.mxu0 %v556_v4  ;;  %538 = vmatprep.subr.bf16.mxu1 %v556_v4  ;;  %v571_v19 = vld [vmem:[%s752_s0 + $0x40] ss:$8 sps:$4 sm:$0xff]   ;;  %v576_v21 = vld [vmem:[%s752_s0 + $0x54] ss:$8 sps:$4 sm:$0xff]   ;;  %v579_v23 = vld [vmem:[%s752_s0 + $0x50] ss:$8 sps:$4 sm:$0xff]  }
   0x9   :  { %336 = vmatprep.mubr.bf16.mxu1 %v573_v12  ;;  %v580_v24 = vld [vmem:[%s752_s0 + $0x24] ss:$8 sps:$4 sm:$0xff]   ;;  %v584_v26 = vld [vmem:[%s752_s0 + $0x20] ss:$8 sps:$4 sm:$0xff]   ;;  %v586_v28 = vld [vmem:[%s752_s0 + $0x34] ss:$8 sps:$4 sm:$0xff]  }
   0xa   :  { %v582_v25 = vld [vmem:[%s752_s0 + $0x64] ss:$8 sps:$4 sm:$0xff]   ;;  %v585_v27 = vld [vmem:[%s752_s0 + $0x60] ss:$8 sps:$4 sm:$0xff]   ;;  %v588_v29 = vld [vmem:[%s752_s0 + $0x74] ss:$8 sps:$4 sm:$0xff]  }
   0xb   :  { %477 = vmatpush3.bf16.msra.mxu0 %v557_v5  ;;  %546 = vmatpush3.bf16.msra.mxu1 %v557_v5  ;;  %v590_v30 = vld [vmem:[%s752_s0 + $0x30] ss:$8 sps:$4 sm:$0xff]  }
   0xc   :  { %478 = vmatprep.subr.bf16.mxu0 %v558_v6  ;;  %539 = vmatprep.subr.bf16.mxu1 %v558_v6  ;;  %v591_v31 = vld [vmem:[%s752_s0 + $0x70] ss:$8 sps:$4 sm:$0xff]  }
   0xf   :  { %479 = vmatpush3.bf16.msra.mxu0 %v559_v7  ;;  %547 = vmatpush3.bf16.msra.mxu1 %v559_v7 }
  0x10   :  { %480 = vmatprep.subr.bf16.mxu0 %v560_v8  ;;  %540 = vmatprep.subr.bf16.mxu1 %v560_v8 }
  0x13   :  { %481 = vmatpush3.bf16.msra.mxu0 %v561_v9  ;;  %548 = vmatpush3.bf16.msra.mxu1 %v561_v9 }
  0x14   :  { %482 = vmatprep.subr.bf16.mxu0 %v562_v10  ;;  %541 = vmatprep.subr.bf16.mxu1 %v562_v10 }
  0x17   :  { %483 = vmatpush3.bf16.msra.mxu0 %v563_v13  ;;  %549 = vmatpush3.bf16.msra.mxu1 %v563_v13 }
  0x18   :  { %484 = vmatprep.subr.bf16.mxu0 %v564_v14  ;;  %542 = vmatprep.subr.bf16.mxu1 %v564_v14 }
  0x1b   :  { %485 = vmatpush3.bf16.msra.mxu0 %v565_v15  ;;  %550 = vmatpush3.bf16.msra.mxu1 %v565_v15 }
  0x1c   :  { %486 = vmatprep.subr.bf16.mxu0 %v566_v16  ;;  %543 = vmatprep.subr.bf16.mxu1 %v566_v16 }
  0x1f   :  { %487 = vmatpush3.bf16.msra.mxu0 %v567_v17  ;;  %551 = vmatpush3.bf16.msra.mxu1 %v567_v17 }
  0x22   :  { %305 = vmatmul.mubr.bf16.vlgmr.msra.gmra.mrb[0].mxu0 %v568_v18  ;;  %337 = vmatmul.mubr.bf16.vlgmr.msra.gmra.mrb[0].mxu1 %v571_v19 }
  0x23   :  { %312 = vmatprep.mubr.bf16.mxu0 %v574_v20  ;;  %344 = vmatprep.mubr.bf16.mxu1 %v576_v21 }
  0x2a   :  { %313 = vmatmul.mubr.bf16.gmra.mrb[4].mxu0 %v578_v22  ;;  %345 = vmatmul.mubr.bf16.gmra.mrb[4].mxu1 %v579_v23 }
  0x2b   :  { %320 = vmatprep.mubr.bf16.mxu0 %v580_v24  ;;  %352 = vmatprep.mubr.bf16.mxu1 %v582_v25 }
  0x32   :  { %321 = vmatmul.mubr.bf16.gmra.mrb[8].mxu0 %v584_v26  ;;  %353 = vmatmul.mubr.bf16.gmra.mrb[8].mxu1 %v585_v27 }
  0x33   :  { %328 = vmatprep.mubr.bf16.mxu0 %v586_v28  ;;  %360 = vmatprep.mubr.bf16.mxu1 %v588_v29 }
  0x3a   :  { %329 = vmatmul.mubr.bf16.gmra.mrb[12].mxu0 %v590_v30  ;;  %361 = vmatmul.mubr.bf16.gmra.mrb[12].mxu1 %v591_v31 }
  0xf5   :  { %v488_v32 = vpop.f32.mrb[0].mxu0  ;;  %v512_v33 = vpop.f32.mrb[0].mxu1 }
  0xf6   :  { %v489_v34 = vpop.f32.mrb[1].mxu0  ;;  %v513_v35 = vpop.f32.mrb[1].mxu1 }
  0xf7   :  { %v490_v36 = vadd.f32 %v489_v34, %v488_v32  ;;  %v514_v37 = vadd.f32 %v513_v35, %v512_v33  ;;  %v491_v38 = vpop.f32.mrb[2].mxu0  ;;  %v515_v39 = vpop.f32.mrb[2].mxu1 }
  0xf8   :  { %v492_v40 = vpop.f32.mrb[3].mxu0  ;;  %v516_v41 = vpop.f32.mrb[3].mxu1 }
  0xf9   :  { %420 = vst [vmem:[%s753_s2] sm:$0xff] %v490_v36  ;;  %428 = vst [vmem:[%s753_s2 + $0x40] sm:$0xff] %v514_v37  ;;  %v493_v42 = vadd.f32 %v492_v40, %v491_v38  ;;  %v517_v43 = vadd.f32 %v516_v41, %v515_v39 }
  0xfb   :  { %421 = vst [vmem:[%s753_s2 + $0x8] sm:$0xff] %v493_v42  ;;  %429 = vst [vmem:[%s753_s2 + $0x48] sm:$0xff] %v517_v43 }
  0xfd   :  { %v494_v44 = vpop.f32.mrb[4].mxu0  ;;  %v518_v45 = vpop.f32.mrb[4].mxu1 }
  0xfe   :  { %v495_v46 = vpop.f32.mrb[5].mxu0  ;;  %v519_v47 = vpop.f32.mrb[5].mxu1 }
  0xff   :  { %v496_v48 = vadd.f32 %v495_v46, %v494_v44  ;;  %v520_v49 = vadd.f32 %v519_v47, %v518_v45  ;;  %v497_v50 = vpop.f32.mrb[6].mxu0  ;;  %v521_v51 = vpop.f32.mrb[6].mxu1 }
 0x100   :  { %v498_v52 = vpop.f32.mrb[7].mxu0  ;;  %v522_v53 = vpop.f32.mrb[7].mxu1 }
 0x101   :  { %422 = vst [vmem:[%s753_s2 + $0x10] sm:$0xff] %v496_v48  ;;  %430 = vst [vmem:[%s753_s2 + $0x50] sm:$0xff] %v520_v49  ;;  %v499_v54 = vadd.f32 %v498_v52, %v497_v50  ;;  %v523_v55 = vadd.f32 %v522_v53, %v521_v51 }
 0x103   :  { %423 = vst [vmem:[%s753_s2 + $0x18] sm:$0xff] %v499_v54  ;;  %431 = vst [vmem:[%s753_s2 + $0x58] sm:$0xff] %v523_v55 }
 0x105   :  { %v500_v56 = vpop.f32.mrb[8].mxu0  ;;  %v524_v57 = vpop.f32.mrb[8].mxu1 }
 0x106   :  { %v501_v58 = vpop.f32.mrb[9].mxu0  ;;  %v525_v59 = vpop.f32.mrb[9].mxu1 }
 0x107   :  { %v502_v60 = vadd.f32 %v501_v58, %v500_v56  ;;  %v526_v61 = vadd.f32 %v525_v59, %v524_v57  ;;  %v503_v62 = vpop.f32.mrb[10].mxu0  ;;  %v527_v63 = vpop.f32.mrb[10].mxu1 }
 0x108   :  { %v504_v0 = vpop.f32.mrb[11].mxu0  ;;  %v528_v1 = vpop.f32.mrb[11].mxu1 }
 0x109   :  { %424 = vst [vmem:[%s753_s2 + $0x20] sm:$0xff] %v502_v60  ;;  %432 = vst [vmem:[%s753_s2 + $0x60] sm:$0xff] %v526_v61  ;;  %v505_v2 = vadd.f32 %v504_v0, %v503_v62  ;;  %v529_v3 = vadd.f32 %v528_v1, %v527_v63 }
 0x10b   :  { %425 = vst [vmem:[%s753_s2 + $0x28] sm:$0xff] %v505_v2  ;;  %433 = vst [vmem:[%s753_s2 + $0x68] sm:$0xff] %v529_v3 }
 0x10d   :  { %v506_v4 = vpop.f32.mrb[12].mxu0  ;;  %v530_v5 = vpop.f32.mrb[12].mxu1 }
 0x10e   :  { %v507_v6 = vpop.f32.mrb[13].mxu0  ;;  %v531_v7 = vpop.f32.mrb[13].mxu1 }
 0x10f   :  { %v508_v8 = vadd.f32 %v507_v6, %v506_v4  ;;  %v532_v9 = vadd.f32 %v531_v7, %v530_v5  ;;  %v509_v10 = vpop.f32.mrb[14].mxu0  ;;  %v533_v11 = vpop.f32.mrb[14].mxu1 }
 0x110   :  { %v510_v12 = vpop.f32.mrb[15].mxu0  ;;  %v534_v13 = vpop.f32.mrb[15].mxu1 }
 0x111   :  { %426 = vst [vmem:[%s753_s2 + $0x30] sm:$0xff] %v508_v8  ;;  %434 = vst [vmem:[%s753_s2 + $0x70] sm:$0xff] %v532_v9  ;;  %v511_v14 = vadd.f32 %v510_v12, %v509_v10  ;;  %v535_v15 = vadd.f32 %v534_v13, %v533_v11 }
 0x113   :  { %427 = vst [vmem:[%s753_s2 + $0x38] sm:$0xff] %v511_v14  ;;  %435 = vst [vmem:[%s753_s2 + $0x78] sm:$0xff] %v535_v15 }

// kernel: _lambda_.13
= control target key start
LH: loop header
LB: loop body
LE: loop exit
PB: predicated region body
PF: predicated region fallthrough
CT: control target
= control target key end

     0   :  { %v112_v0 = vmov 0.0   ;;  %s182_s0 = inlined_call_operand.vmem [shape: f32[128,128], index: 0, kind: input, shape index: {}]   ;;  %s183_s1 = inlined_call_operand.vmem [shape: f32[1,128], index: 1, kind: output, shape index: {0}]   ;;  %s184_s2 = inlined_call_operand.vmem [shape: f32[1,128], index: 2, kind: output, shape index: {1}]  }
   0x1   :  { %14 = vst [vmem:[#allocation2] sm:$0x1] %v112_v0  ;;  %15 = vst [vmem:[#allocation3] sm:$0x1] %v112_v0  ;;  %v16_v1 = vld [vmem:[%s182_s0] sm:$0xff]  ;;  %v17_v2 = vld [vmem:[%s182_s0 + $0x8] sm:$0xff] }
   0x2   :  { %v18_v3 = vld [vmem:[%s182_s0 + $0x10] sm:$0xff]  ;;  %v19_v4 = vld [vmem:[%s182_s0 + $0x18] sm:$0xff]  ;;  %v33_v5 = vadd.f32 %v17_v2, %v16_v1  ;;  %v57_v6 = vmul.f32 %v16_v1, %v16_v1  ;;  %v58_v7 = vmul.f32 %v17_v2, %v17_v2  ;;  %v20_v9 = vld [vmem:[%s182_s0 + $0x20] sm:$0xff] }
   0x3   :  { %v59_v8 = vmul.f32 %v18_v3, %v18_v3  ;;  %v60_v11 = vmul.f32 %v19_v4, %v19_v4  ;;  %v21_v13 = vld [vmem:[%s182_s0 + $0x28] sm:$0xff]  ;;  %v61_v15 = vmul.f32 %v20_v9, %v20_v9  ;;  %v22_v17 = vld [vmem:[%s182_s0 + $0x30] sm:$0xff]  ;;  %v23_v21 = vld [vmem:[%s182_s0 + $0x38] sm:$0xff] }
   0x4   :  { %v34_v10 = vadd.f32 %v33_v5, %v18_v3  ;;  %v73_v12 = vadd.f32 %v58_v7, %v57_v6  ;;  %v62_v19 = vmul.f32 %v21_v13, %v21_v13  ;;  %v63_v23 = vmul.f32 %v22_v17, %v22_v17  ;;  %v24_v25 = vld [vmem:[%s182_s0 + $0x40] sm:$0xff]  ;;  %v25_v29 = vld [vmem:[%s182_s0 + $0x48] sm:$0xff]  ;;  %v26_v33 = vld [vmem:[%s182_s0 + $0x50] sm:$0xff] }
   0x5   :  { %v64_v27 = vmul.f32 %v23_v21, %v23_v21  ;;  %v65_v31 = vmul.f32 %v24_v25, %v24_v25  ;;  %v66_v35 = vmul.f32 %v25_v29, %v25_v29  ;;  %v27_v37 = vld [vmem:[%s182_s0 + $0x58] sm:$0xff]  ;;  %v67_v39 = vmul.f32 %v26_v33, %v26_v33  ;;  %v28_v41 = vld [vmem:[%s182_s0 + $0x60] sm:$0xff]  ;;  %v29_v45 = vld [vmem:[%s182_s0 + $0x68] sm:$0xff] }
   0x6   :  { %v35_v14 = vadd.f32 %v34_v10, %v19_v4  ;;  %v74_v16 = vadd.f32 %v73_v12, %v59_v8  ;;  %v68_v43 = vmul.f32 %v27_v37, %v27_v37  ;;  %v69_v47 = vmul.f32 %v28_v41, %v28_v41  ;;  %v30_v49 = vld [vmem:[%s182_s0 + $0x70] sm:$0xff]  ;;  %v31_v53 = vld [vmem:[%s182_s0 + $0x78] sm:$0xff] }
   0x7   :  { %v70_v51 = vmul.f32 %v29_v45, %v29_v45  ;;  %v71_v55 = vmul.f32 %v30_v49, %v30_v49  ;;  %v72_v58 = vmul.f32 %v31_v53, %v31_v53 }
   0x8   :  { %v36_v18 = vadd.f32 %v35_v14, %v20_v9  ;;  %v75_v20 = vadd.f32 %v74_v16, %v60_v11  ;;  %v32_v7 = vld [vmem:[#allocation2] sm:$0x1]  ;;  %v56_v12 = vld [vmem:[#allocation3] sm:$0x1] }
   0xa   :  { %v37_v22 = vadd.f32 %v36_v18, %v21_v13  ;;  %v76_v24 = vadd.f32 %v75_v20, %v61_v15 }
   0xc   :  { %v38_v26 = vadd.f32 %v37_v22, %v22_v17  ;;  %v77_v28 = vadd.f32 %v76_v24, %v62_v19 }
   0xe   :  { %v39_v30 = vadd.f32 %v38_v26, %v23_v21  ;;  %v78_v32 = vadd.f32 %v77_v28, %v63_v23 }
  0x10   :  { %v40_v34 = vadd.f32 %v39_v30, %v24_v25  ;;  %v79_v36 = vadd.f32 %v78_v32, %v64_v27 }
  0x12   :  { %v41_v38 = vadd.f32 %v40_v34, %v25_v29  ;;  %v80_v40 = vadd.f32 %v79_v36, %v65_v31 }
  0x14   :  { %v42_v42 = vadd.f32 %v41_v38, %v26_v33  ;;  %v81_v44 = vadd.f32 %v80_v40, %v66_v35 }
  0x16   :  { %v43_v46 = vadd.f32 %v42_v42, %v27_v37  ;;  %v82_v48 = vadd.f32 %v81_v44, %v67_v39 }
  0x18   :  { %v44_v50 = vadd.f32 %v43_v46, %v28_v41  ;;  %v83_v52 = vadd.f32 %v82_v48, %v68_v43 }
  0x1a   :  { %v45_v54 = vadd.f32 %v44_v50, %v29_v45  ;;  %v84_v56 = vadd.f32 %v83_v52, %v69_v47 }
  0x1c   :  { %v46_v57 = vadd.f32 %v45_v54, %v30_v49  ;;  %v85_v59 = vadd.f32 %v84_v56, %v70_v51 }
  0x1e   :  { %v47_v60 = vadd.f32 %v46_v57, %v31_v53  ;;  %v86_v61 = vadd.f32 %v85_v59, %v71_v55 }
  0x20   :  { %v48_v62 = vrot.slane %v47_v60, 4  ;;  %v87_v63 = vadd.f32 %v86_v61, %v72_v58 }
  0x22   :  { %v49_v0 = vadd.f32 %v48_v62, %v47_v60  ;;  %v88_v1 = vrot.slane %v87_v63, 4 }
  0x24   :  { %v50_v2 = vrot.slane %v49_v0, 2  ;;  %v89_v3 = vadd.f32 %v88_v1, %v87_v63 }
  0x26   :  { %v51_v4 = vadd.f32 %v50_v2, %v49_v0  ;;  %v90_v5 = vrot.slane %v89_v3, 2 }
  0x28   :  { %v52_v6 = vrot.slane %v51_v4, 1  ;;  %v91_v8 = vadd.f32 %v90_v5, %v89_v3 }
  0x2a   :  { %v53_v9 = vadd.f32 %v52_v6, %v51_v4  ;;  %v92_v10 = vrot.slane %v91_v8, 1 }
  0x2c   :  { %v54_v11 = vadd.f32 %v53_v9, %v32_v7  ;;  %v93_v13 = vadd.f32 %v92_v10, %v91_v8 }
  0x2e   :  { %55 = vst [vmem:[#allocation2] sm:$0x1] %v54_v11  ;;  %v94_v14 = vadd.f32 %v93_v13, %v56_v12 }
  0x30   :  { %95 = vst [vmem:[#allocation3] sm:$0x1] %v94_v14 }
  0x35   :  { %v99_v15 = vld [vmem:[#allocation2] sm:$0x1] }
  0x36   :  { %100 = vst [vmem:[%s183_s1] sm:$0x1] %v99_v15 }
  0x37   :  { %v101_v16 = vld [vmem:[#allocation3] sm:$0x1] }
  0x38   :  { %102 = vst [vmem:[%s184_s2] sm:$0x1] %v101_v16 }

// kernel: _lambda_.14
= control target key start
LH: loop header
LB: loop body
LE: loop exit
PB: predicated region body
PF: predicated region fallthrough
CT: control target
= control target key end

     0   :  { %s423_s0 = inlined_call_operand.vmem [shape: f32[128,128], index: 0, kind: input, shape index: {}]   ;;  %s424_s1 = inlined_call_operand.vmem [shape: f32[1,128], index: 1, kind: input, shape index: {}]   ;;  %s425_s2 = inlined_call_operand.vmem [shape: f32[1,128], index: 2, kind: input, shape index: {}]   ;;  %s426_s3 = inlined_call_operand.vmem [shape: bf16[128,128], index: 3, kind: output, shape index: {}]  }
   0x1   :  { %v14_v0 = vld [vmem:[%s423_s0] sm:$0xff]  ;;  %v15_v1 = vld [vmem:[%s423_s0 + $0x8] sm:$0xff]  ;;  %v16_v6 = vld [vmem:[%s423_s0 + $0x10] sm:$0xff] }
   0x2   :  { %v318_v2 = vld [vmem:[%s424_s1] ss:$0 sm:$0xff]  ;;  %v17_v7 = vld [vmem:[%s423_s0 + $0x18] sm:$0xff]  ;;  %v19_v11 = vld [vmem:[%s423_s0 + $0x28] sm:$0xff] }
   0x3   :  { %v37_v3 = vmul.f32 %v318_v2, %v14_v0  ;;  %v38_v4 = vmul.f32 %v318_v2, %v15_v1  ;;  %v325_v5 = vld [vmem:[%s425_s2] ss:$0 sm:$0xff]  ;;  %v39_v8 = vmul.f32 %v318_v2, %v16_v6  ;;  %v40_v9 = vmul.f32 %v318_v2, %v17_v7  ;;  %v20_v12 = vld [vmem:[%s423_s0 + $0x30] sm:$0xff]  ;;  %v21_v17 = vld [vmem:[%s423_s0 + $0x38] sm:$0xff] }
   0x4   :  { %v18_v10 = vld [vmem:[%s423_s0 + $0x20] sm:$0xff]  ;;  %v42_v16 = vmul.f32 %v318_v2, %v19_v11  ;;  %v43_v20 = vmul.f32 %v318_v2, %v20_v12  ;;  %v44_v21 = vmul.f32 %v318_v2, %v21_v17  ;;  %v23_v35 = vld [vmem:[%s423_s0 + $0x48] sm:$0xff]  ;;  %v24_v36 = vld [vmem:[%s423_s0 + $0x50] sm:$0xff] }
   0x5   :  { %v60_v13 = vadd.f32 %v325_v5, %v37_v3  ;;  %v61_v14 = vadd.f32 %v325_v5, %v38_v4  ;;  %v41_v15 = vmul.f32 %v318_v2, %v18_v10  ;;  %v62_v18 = vadd.f32 %v325_v5, %v39_v8  ;;  %v22_v34 = vld [vmem:[%s423_s0 + $0x40] sm:$0xff]  ;;  %v25_v42 = vld [vmem:[%s423_s0 + $0x58] sm:$0xff]  ;;  %v27_v48 = vld [vmem:[%s423_s0 + $0x68] sm:$0xff] }
   0x6   :  { %v63_v19 = vadd.f32 %v325_v5, %v40_v9  ;;  %v65_v29 = vadd.f32 %v325_v5, %v42_v16  ;;  %v66_v33 = vadd.f32 %v325_v5, %v43_v20  ;;  %v67_v40 = vadd.f32 %v325_v5, %v44_v21  ;;  %v26_v47 = vld [vmem:[%s423_s0 + $0x60] sm:$0xff]  ;;  %v28_v60 = vld [vmem:[%s423_s0 + $0x70] sm:$0xff]  ;;  %v29_v7 = vld [vmem:[%s423_s0 + $0x78] sm:$0xff] }
   0x7   :  { %vm76_vm0 = vcmp.gt.f32.partialorder %v60_v13, 0.0  ;;  %vm77_vm1 = vcmp.gt.f32.partialorder %v61_v14, 0.0  ;;  %v92_v22 = vmul.f32 0.2, %v60_v13  ;;  %v93_v23 = vmul.f32 0.2, %v61_v14 }
   0x8   :  { %vm78_vm2 = vcmp.gt.f32.partialorder %v62_v18, 0.0  ;;  %vm79_vm3 = vcmp.gt.f32.partialorder %v63_v19, 0.0  ;;  %v94_v24 = vmul.f32 0.2, %v62_v18  ;;  %v95_v25 = vmul.f32 0.2, %v63_v19 }
   0x9   :  { %v108_v26 = vsel %vm76_vm0, %v60_v13, %v92_v22  ;;  %v109_v27 = vsel %vm77_vm1, %v61_v14, %v93_v23  ;;  %v64_v28 = vadd.f32 %v325_v5, %v41_v15  ;;  %vm81_vm5 = vcmp.gt.f32.partialorder %v65_v29, 0.0 }
   0xa   :  { %v245_v30 = vpack.c.bf16 %v109_v27, %v108_v26  ;;  %v110_v31 = vsel %vm78_vm2, %v62_v18, %v94_v24  ;;  %v111_v32 = vsel %vm79_vm3, %v63_v19, %v95_v25  ;;  %v97_v39 = vmul.f32 0.2, %v65_v29 }
   0xb   :  { %v250_v37 = vpack.c.bf16 %v111_v32, %v110_v31  ;;  %vm80_vm4 = vcmp.gt.f32.partialorder %v64_v28, 0.0  ;;  %v96_v38 = vmul.f32 0.2, %v64_v28  ;;  %vm82_vm6 = vcmp.gt.f32.partialorder %v66_v33, 0.0 }
   0xc   :  { %246 = vst [vmem:[%s426_s3] sm:$0xff] %v245_v30   ;;  %v98_v41 = vmul.f32 0.2, %v66_v33  ;;  %v45_v44 = vmul.f32 %v318_v2, %v22_v34  ;;  %v46_v45 = vmul.f32 %v318_v2, %v23_v35  ;;  %v47_v46 = vmul.f32 %v318_v2, %v24_v36 }
   0xd   :  { %282 = vst [vmem:[%s426_s3 + $0x8] sm:$0xff] %v250_v37   ;;  %v112_v43 = vsel %vm80_vm4, %v64_v28, %v96_v38  ;;  %v113_v49 = vsel %vm81_vm5, %v65_v29, %v97_v39  ;;  %vm83_vm7 = vcmp.gt.f32.partialorder %v67_v40, 0.0  ;;  %v99_v50 = vmul.f32 0.2, %v67_v40 }
   0xe   :  { %v114_v51 = vsel %vm82_vm6, %v66_v33, %v98_v41  ;;  %v255_v52 = vpack.c.bf16 %v113_v49, %v112_v43  ;;  %v68_v53 = vadd.f32 %v325_v5, %v45_v44  ;;  %v69_v54 = vadd.f32 %v325_v5, %v46_v45 }
   0xf   :  { %v48_v55 = vmul.f32 %v318_v2, %v25_v42  ;;  %v115_v56 = vsel %vm83_vm7, %v67_v40, %v99_v50  ;;  %v70_v57 = vadd.f32 %v325_v5, %v47_v46  ;;  %v49_v58 = vmul.f32 %v318_v2, %v26_v47 }
  0x10   :  { %v50_v59 = vmul.f32 %v318_v2, %v27_v48  ;;  %283 = vst [vmem:[%s426_s3 + $0x10] sm:$0xff] %v255_v52   ;;  %v260_v61 = vpack.c.bf16 %v115_v56, %v114_v51  ;;  %vm84_vm8 = vcmp.gt.f32.partialorder %v68_v53, 0.0  ;;  %vm85_vm9 = vcmp.gt.f32.partialorder %v69_v54, 0.0 }
  0x11   :  { %v100_v62 = vmul.f32 0.2, %v68_v53  ;;  %v101_v63 = vmul.f32 0.2, %v69_v54  ;;  %v71_v0 = vadd.f32 %v325_v5, %v48_v55  ;;  %vm86_vm10 = vcmp.gt.f32.partialorder %v70_v57, 0.0 }
  0x12   :  { %v102_v1 = vmul.f32 0.2, %v70_v57  ;;  %284 = vst [vmem:[%s426_s3 + $0x18] sm:$0xff] %v260_v61   ;;  %v72_v4 = vadd.f32 %v325_v5, %v49_v58  ;;  %v73_v6 = vadd.f32 %v325_v5, %v50_v59  ;;  %v51_v8 = vmul.f32 %v318_v2, %v28_v60 }
  0x13   :  { %v116_v3 = vsel %vm84_vm8, %v68_v53, %v100_v62  ;;  %v117_v9 = vsel %vm85_vm9, %v69_v54, %v101_v63  ;;  %vm87_vm11 = vcmp.gt.f32.partialorder %v71_v0, 0.0  ;;  %v103_v10 = vmul.f32 0.2, %v71_v0 }
  0x14   :  { %v118_v11 = vsel %vm86_vm10, %v70_v57, %v102_v1  ;;  %v265_v12 = vpack.c.bf16 %v117_v9, %v116_v3  ;;  %vm88_vm12 = vcmp.gt.f32.partialorder %v72_v4, 0.0  ;;  %vm89_vm13 = vcmp.gt.f32.partialorder %v73_v6, 0.0 }
  0x15   :  { %v104_v13 = vmul.f32 0.2, %v72_v4  ;;  %v119_v14 = vsel %vm87_vm11, %v71_v0, %v103_v10  ;;  %v105_v15 = vmul.f32 0.2, %v73_v6  ;;  %v52_v16 = vmul.f32 %v318_v2, %v29_v7 }
  0x16   :  { %v74_v17 = vadd.f32 %v325_v5, %v51_v8  ;;  %285 = vst [vmem:[%s426_s3 + $0x20] sm:$0xff] %v265_v12   ;;  %v270_v18 = vpack.c.bf16 %v119_v14, %v118_v11 }
  0x17   :  { %v120_v19 = vsel %vm88_vm12, %v72_v4, %v104_v13  ;;  %v121_v20 = vsel %vm89_vm13, %v73_v6, %v105_v15  ;;  %v75_v21 = vadd.f32 %v325_v5, %v52_v16 }
  0x18   :  { %vm90_vm14 = vcmp.gt.f32.partialorder %v74_v17, 0.0  ;;  %v106_v22 = vmul.f32 0.2, %v74_v17  ;;  %286 = vst [vmem:[%s426_s3 + $0x28] sm:$0xff] %v270_v18   ;;  %v275_v23 = vpack.c.bf16 %v121_v20, %v120_v19 }
  0x19   :  { %vm91_vm15 = vcmp.gt.f32.partialorder %v75_v21, 0.0  ;;  %v107_v2 = vmul.f32 0.2, %v75_v21 }
  0x1a   :  { %v122_v24 = vsel %vm90_vm14, %v74_v17, %v106_v22  ;;  %287 = vst [vmem:[%s426_s3 + $0x30] sm:$0xff] %v275_v23  }
  0x1b   :  { %v123_v25 = vsel %vm91_vm15, %v75_v21, %v107_v2 }
  0x1c   :  { %v280_v26 = vpack.c.bf16 %v123_v25, %v122_v24 }
  0x1e   :  { %288 = vst [vmem:[%s426_s3 + $0x38] sm:$0xff] %v280_v26  }

// kernel: _lambda_.15
= control target key start
LH: loop header
LB: loop body
LE: loop exit
PB: predicated region body
PF: predicated region fallthrough
CT: control target
= control target key end

     0   :  { %s736_s1 = inlined_call_operand.vmem [shape: bf16[512,128], index: 1, kind: input, shape index: {}]   ;;  %s737_s0 = inlined_call_operand.vmem [shape: bf16[32,512], index: 0, kind: input, shape index: {}]   ;;  %s738_s2 = inlined_call_operand.vmem [shape: f32[32,128], index: 2, kind: output, shape index: {}]  }
   0x1   :  { %v545_v0 = vld [vmem:[%s736_s1 + $0x40] sm:$0xff]   ;;  %v549_v4 = vld [vmem:[%s736_s1 + $0x48] sm:$0xff]   ;;  %v553_v8 = vld [vmem:[%s736_s1 + $0x50] sm:$0xff]  }
   0x2   :  { %v546_v1 = vld [vmem:[%s736_s1 + $0xc0] sm:$0xff]   ;;  %489 = vmatprep.subr.bf16.mxu0 %v545_v0  ;;  %v550_v5 = vld [vmem:[%s736_s1 + $0xc8] sm:$0xff]   ;;  %v554_v9 = vld [vmem:[%s736_s1 + $0xd0] sm:$0xff]  }
   0x3   :  { %v547_v2 = vld [vmem:[%s736_s1] sm:$0xff]   ;;  %517 = vmatprep.subr.bf16.mxu1 %v546_v1  ;;  %v551_v6 = vld [vmem:[%s736_s1 + $0x8] sm:$0xff]   ;;  %v555_v10 = vld [vmem:[%s736_s1 + $0x10] sm:$0xff]  }
   0x4   :  { %v548_v3 = vld [vmem:[%s736_s1 + $0x80] sm:$0xff]   ;;  %490 = vmatpush3.bf16.msra.mxu0 %v547_v2  ;;  %v552_v7 = vld [vmem:[%s736_s1 + $0x88] sm:$0xff]   ;;  %v556_v11 = vld [vmem:[%s736_s1 + $0x90] sm:$0xff]  }
   0x5   :  { %518 = vmatpush3.bf16.msra.mxu1 %v548_v3  ;;  %491 = vmatprep.subr.bf16.mxu0 %v549_v4  ;;  %v557_v12 = vld [vmem:[%s736_s1 + $0x58] sm:$0xff]   ;;  %v561_v16 = vld [vmem:[%s736_s1 + $0x60] sm:$0xff]   ;;  %v565_v20 = vld [vmem:[%s736_s1 + $0x68] sm:$0xff]  }
   0x6   :  { %519 = vmatprep.subr.bf16.mxu1 %v550_v5  ;;  %v558_v13 = vld [vmem:[%s736_s1 + $0xd8] sm:$0xff]   ;;  %v562_v17 = vld [vmem:[%s736_s1 + $0xe0] sm:$0xff]   ;;  %v566_v21 = vld [vmem:[%s736_s1 + $0xe8] sm:$0xff]  }
   0x7   :  { %v559_v14 = vld [vmem:[%s736_s1 + $0x18] sm:$0xff]   ;;  %v563_v18 = vld [vmem:[%s736_s1 + $0x20] sm:$0xff]   ;;  %v567_v22 = vld [vmem:[%s736_s1 + $0x28] sm:$0xff]  }
   0x8   :  { %492 = vmatpush3.bf16.msra.mxu0 %v551_v6  ;;  %v560_v15 = vld [vmem:[%s736_s1 + $0x98] sm:$0xff]   ;;  %v564_v19 = vld [vmem:[%s736_s1 + $0xa0] sm:$0xff]   ;;  %v568_v23 = vld [vmem:[%s736_s1 + $0xa8] sm:$0xff]  }
   0x9   :  { %520 = vmatpush3.bf16.msra.mxu1 %v552_v7  ;;  %493 = vmatprep.subr.bf16.mxu0 %v553_v8  ;;  %v569_v24 = vld [vmem:[%s736_s1 + $0x70] sm:$0xff]   ;;  %v573_v28 = vld [vmem:[%s736_s1 + $0x78] sm:$0xff]  }
   0xa   :  { %521 = vmatprep.subr.bf16.mxu1 %v554_v9  ;;  %v570_v25 = vld [vmem:[%s736_s1 + $0xf0] sm:$0xff]   ;;  %v574_v29 = vld [vmem:[%s736_s1 + $0xf8] sm:$0xff]  }
   0xb   :  { %v571_v26 = vld [vmem:[%s736_s1 + $0x30] sm:$0xff]   ;;  %v575_v30 = vld [vmem:[%s736_s1 + $0x38] sm:$0xff]  }
   0xc   :  { %494 = vmatpush3.bf16.msra.mxu0 %v555_v10  ;;  %v572_v27 = vld [vmem:[%s736_s1 + $0xb0] sm:$0xff]   ;;  %v576_v31 = vld [vmem:[%s736_s1 + $0xb8] sm:$0xff]  }
   0xd   :  { %522 = vmatpush3.bf16.msra.mxu1 %v556_v11  ;;  %495 = vmatprep.subr.bf16.mxu0 %v557_v12  ;;  %v577_v32 = vld [vmem:[%s737_s0] ss:$16 sps:$4 sm:$0xff]   ;;  %v579_v33 = vld [vmem:[%s737_s0 + $0x4] ss:$16 sps:$4 sm:$0xff]   ;;  %v580_v34 = vld [vmem:[%s737_s0 + $0x8] ss:$16 sps:$4 sm:$0xff]  }
   0xe   :  { %523 = vmatprep.subr.bf16.mxu1 %v558_v13  ;;  %v582_v35 = vld [vmem:[%s737_s0 + $0xc] ss:$16 sps:$4 sm:$0xff]   ;;  %360 = vmatprep.mubr.bf16.mxu0 %v579_v33  ;;  %v583_v36 = vld [vmem:[%s737_s0 + $0x24] ss:$16 sps:$4 sm:$0xff]   ;;  %v587_v38 = vld [vmem:[%s737_s0 + $0x20] ss:$16 sps:$4 sm:$0xff]  }
   0xf   :  { %409 = vmatprep.mubr.bf16.mxu1 %v582_v35  ;;  %v585_v37 = vld [vmem:[%s737_s0 + $0x2c] ss:$16 sps:$4 sm:$0xff]   ;;  %v588_v39 = vld [vmem:[%s737_s0 + $0x28] ss:$16 sps:$4 sm:$0xff]  }
  0x10   :  { %496 = vmatpush3.bf16.msra.mxu0 %v559_v14 }
  0x11   :  { %524 = vmatpush3.bf16.msra.mxu1 %v560_v15  ;;  %497 = vmatprep.subr.bf16.mxu0 %v561_v16 }
  0x12   :  { %525 = vmatprep.subr.bf16.mxu1 %v562_v17 }
  0x14   :  { %498 = vmatpush3.bf16.msra.mxu0 %v563_v18 }
  0x15   :  { %526 = vmatpush3.bf16.msra.mxu1 %v564_v19  ;;  %499 = vmatprep.subr.bf16.mxu0 %v565_v20 }
  0x16   :  { %527 = vmatprep.subr.bf16.mxu1 %v566_v21 }
  0x18   :  { %500 = vmatpush3.bf16.msra.mxu0 %v567_v22 }
  0x19   :  { %528 = vmatpush3.bf16.msra.mxu1 %v568_v23  ;;  %501 = vmatprep.subr.bf16.mxu0 %v569_v24 }
  0x1a   :  { %529 = vmatprep.subr.bf16.mxu1 %v570_v25 }
  0x1c   :  { %502 = vmatpush3.bf16.msra.mxu0 %v571_v26 }
  0x1d   :  { %530 = vmatpush3.bf16.msra.mxu1 %v572_v27  ;;  %503 = vmatprep.subr.bf16.mxu0 %v573_v28 }
  0x1e   :  { %531 = vmatprep.subr.bf16.mxu1 %v574_v29 }
  0x20   :  { %504 = vmatpush3.bf16.msra.mxu0 %v575_v30 }
  0x21   :  { %532 = vmatpush3.bf16.msra.mxu1 %v576_v31 }
  0x23   :  { %361 = vmatmul.mubr.bf16.vlgmr.msra.gmra.mrb[0].mxu0 %v577_v32 }
  0x24   :  { %410 = vmatmul.mubr.bf16.vlgmr.msra.gmra.mrb[0].mxu1 %v580_v34  ;;  %368 = vmatprep.mubr.bf16.mxu0 %v583_v36 }
  0x25   :  { %417 = vmatprep.mubr.bf16.mxu1 %v585_v37 }
  0x2b   :  { %369 = vmatmul.mubr.bf16.gmra.mrb[4].mxu0 %v587_v38 }
  0x2c   :  { %418 = vmatmul.mubr.bf16.gmra.mrb[4].mxu1 %v588_v39 }
  0xf6   :  { %v505_v40 = vpop.f32.mrb[0].mxu0 }
  0xf7   :  { %v533_v41 = vpop.f32.mrb[0].mxu1  ;;  %v506_v42 = vpop.f32.mrb[1].mxu0 }
  0xf8   :  { %v507_v43 = vadd.f32 %v506_v42, %v505_v40  ;;  %v534_v44 = vpop.f32.mrb[1].mxu1  ;;  %v508_v45 = vpop.f32.mrb[2].mxu0 }
  0xf9   :  { %v535_v46 = vadd.f32 %v534_v44, %v533_v41  ;;  %v536_v47 = vpop.f32.mrb[2].mxu1  ;;  %v509_v48 = vpop.f32.mrb[3].mxu0 }
  0xfa   :  { %v510_v49 = vadd.f32 %v509_v48, %v508_v45  ;;  %v537_v50 = vpop.f32.mrb[3].mxu1 }
  0xfb   :  { %v412_v51 = vadd.f32 %v535_v46, %v507_v43  ;;  %v538_v52 = vadd.f32 %v537_v50, %v536_v47 }
  0xfd   :  { %441 = vst [vmem:[%s738_s2] sm:$0xff] %v412_v51  ;;  %v415_v53 = vadd.f32 %v538_v52, %v510_v49 }
  0xfe   :  { %v511_v54 = vpop.f32.mrb[4].mxu0 }
  0xff   :  { %442 = vst [vmem:[%s738_s2 + $0x8] sm:$0xff] %v415_v53  ;;  %v539_v55 = vpop.f32.mrb[4].mxu1  ;;  %v512_v56 = vpop.f32.mrb[5].mxu0 }
 0x100   :  { %v513_v57 = vadd.f32 %v512_v56, %v511_v54  ;;  %v540_v58 = vpop.f32.mrb[5].mxu1  ;;  %v514_v59 = vpop.f32.mrb[6].mxu0 }
 0x101   :  { %v541_v60 = vadd.f32 %v540_v58, %v539_v55  ;;  %v542_v61 = vpop.f32.mrb[6].mxu1  ;;  %v515_v62 = vpop.f32.mrb[7].mxu0 }
 0x102   :  { %v516_v63 = vadd.f32 %v515_v62, %v514_v59  ;;  %v543_v0 = vpop.f32.mrb[7].mxu1 }
 0x103   :  { %v420_v1 = vadd.f32 %v541_v60, %v513_v57  ;;  %v544_v2 = vadd.f32 %v543_v0, %v542_v61 }
 0x105   :  { %443 = vst [vmem:[%s738_s2 + $0x10] sm:$0xff] %v420_v1  ;;  %v423_v3 = vadd.f32 %v544_v2, %v516_v63 }
 0x107   :  { %444 = vst [vmem:[%s738_s2 + $0x18] sm:$0xff] %v423_v3 }

// kernel: _lambda_.16
= control target key start
LH: loop header
LB: loop body
LE: loop exit
PB: predicated region body
PF: predicated region fallthrough
CT: control target
= control target key end

     0   :  { %v64_v0 = vmov 0.0   ;;  %s98_s0 = inlined_call_operand.vmem [shape: f32[32,128], index: 0, kind: input, shape index: {}]   ;;  %s99_s1 = inlined_call_operand.vmem [shape: f32[1,128], index: 1, kind: output, shape index: {0}]   ;;  %s100_s2 = inlined_call_operand.vmem [shape: f32[1,128], index: 2, kind: output, shape index: {1}]  }
   0x1   :  { %14 = vst [vmem:[#allocation2] sm:$0x1] %v64_v0  ;;  %15 = vst [vmem:[#allocation3] sm:$0x1] %v64_v0  ;;  %v16_v1 = vld [vmem:[%s98_s0] sm:$0xff]  ;;  %v17_v2 = vld [vmem:[%s98_s0 + $0x8] sm:$0xff] }
   0x2   :  { %v18_v3 = vld [vmem:[%s98_s0 + $0x10] sm:$0xff]  ;;  %v19_v4 = vld [vmem:[%s98_s0 + $0x18] sm:$0xff]  ;;  %v21_v5 = vadd.f32 %v17_v2, %v16_v1  ;;  %v33_v6 = vmul.f32 %v16_v1, %v16_v1  ;;  %v34_v7 = vmul.f32 %v17_v2, %v17_v2 }
   0x3   :  { %v35_v8 = vmul.f32 %v18_v3, %v18_v3  ;;  %v36_v10 = vmul.f32 %v19_v4, %v19_v4 }
   0x4   :  { %v22_v9 = vadd.f32 %v21_v5, %v18_v3  ;;  %v37_v11 = vadd.f32 %v34_v7, %v33_v6 }
   0x6   :  { %v23_v12 = vadd.f32 %v22_v9, %v19_v4  ;;  %v38_v13 = vadd.f32 %v37_v11, %v35_v8 }
   0x8   :  { %v24_v14 = vrot.slane %v23_v12, 4  ;;  %v39_v15 = vadd.f32 %v38_v13, %v36_v10  ;;  %v20_v24 = vld [vmem:[#allocation2] sm:$0x1]  ;;  %v32_v27 = vld [vmem:[#allocation3] sm:$0x1] }
   0xa   :  { %v25_v16 = vadd.f32 %v24_v14, %v23_v12  ;;  %v40_v17 = vrot.slane %v39_v15, 4 }
   0xc   :  { %v26_v18 = vrot.slane %v25_v16, 2  ;;  %v41_v19 = vadd.f32 %v40_v17, %v39_v15 }
   0xe   :  { %v27_v20 = vadd.f32 %v26_v18, %v25_v16  ;;  %v42_v21 = vrot.slane %v41_v19, 2 }
  0x10   :  { %v28_v22 = vrot.slane %v27_v20, 1  ;;  %v43_v23 = vadd.f32 %v42_v21, %v41_v19 }
  0x12   :  { %v29_v25 = vadd.f32 %v28_v22, %v27_v20  ;;  %v44_v26 = vrot.slane %v43_v23, 1 }
  0x14   :  { %v30_v28 = vadd.f32 %v29_v25, %v20_v24  ;;  %v45_v29 = vadd.f32 %v44_v26, %v43_v23 }
  0x16   :  { %31 = vst [vmem:[#allocation2] sm:$0x1] %v30_v28  ;;  %v46_v30 = vadd.f32 %v45_v29, %v32_v27 }
  0x18   :  { %47 = vst [vmem:[#allocation3] sm:$0x1] %v46_v30 }
  0x1d   :  { %v51_v31 = vld [vmem:[#allocation2] sm:$0x1] }
  0x1e   :  { %52 = vst [vmem:[%s99_s1] sm:$0x1] %v51_v31 }
  0x1f   :  { %v53_v32 = vld [vmem:[#allocation3] sm:$0x1] }
  0x20   :  { %54 = vst [vmem:[%s100_s2] sm:$0x1] %v53_v32 }

// kernel: _lambda_.17
= control target key start
LH: loop header
LB: loop body
LE: loop exit
PB: predicated region body
PF: predicated region fallthrough
CT: control target
= control target key end

     0   :  { %s141_s0 = inlined_call_operand.vmem [shape: f32[32,128], index: 0, kind: input, shape index: {}]   ;;  %s142_s1 = inlined_call_operand.vmem [shape: f32[1,128], index: 1, kind: input, shape index: {}]   ;;  %s143_s2 = inlined_call_operand.vmem [shape: f32[1,128], index: 2, kind: input, shape index: {}]   ;;  %s144_s3 = inlined_call_operand.vmem [shape: bf16[32,128], index: 3, kind: output, shape index: {}]  }
   0x1   :  { %v14_v0 = vld [vmem:[%s141_s0] sm:$0xff]  ;;  %v15_v1 = vld [vmem:[%s141_s0 + $0x8] sm:$0xff]  ;;  %v16_v6 = vld [vmem:[%s141_s0 + $0x10] sm:$0xff] }
   0x2   :  { %v76_v2 = vld [vmem:[%s142_s1] ss:$0 sm:$0xff]  ;;  %v17_v7 = vld [vmem:[%s141_s0 + $0x18] sm:$0xff] }
   0x3   :  { %v25_v3 = vmul.f32 %v76_v2, %v14_v0  ;;  %v26_v4 = vmul.f32 %v76_v2, %v15_v1  ;;  %v77_v5 = vld [vmem:[%s143_s2] ss:$0 sm:$0xff]  ;;  %v27_v8 = vmul.f32 %v76_v2, %v16_v6  ;;  %v28_v9 = vmul.f32 %v76_v2, %v17_v7 }
   0x5   :  { %v36_v10 = vadd.f32 %v77_v5, %v25_v3  ;;  %v37_v11 = vadd.f32 %v77_v5, %v26_v4  ;;  %v38_v12 = vadd.f32 %v77_v5, %v27_v8  ;;  %v39_v13 = vadd.f32 %v77_v5, %v28_v9 }
   0x7   :  { %vm40_vm0 = vcmp.gt.f32.partialorder %v36_v10, 0.0  ;;  %vm41_vm1 = vcmp.gt.f32.partialorder %v37_v11, 0.0  ;;  %v44_v14 = vmul.f32 0.2, %v36_v10  ;;  %v45_v15 = vmul.f32 0.2, %v37_v11 }
   0x8   :  { %vm42_vm2 = vcmp.gt.f32.partialorder %v38_v12, 0.0  ;;  %vm43_vm3 = vcmp.gt.f32.partialorder %v39_v13, 0.0  ;;  %v46_v16 = vmul.f32 0.2, %v38_v12  ;;  %v47_v17 = vmul.f32 0.2, %v39_v13 }
   0x9   :  { %v48_v18 = vsel %vm40_vm0, %v36_v10, %v44_v14  ;;  %v49_v19 = vsel %vm41_vm1, %v37_v11, %v45_v15 }
   0xa   :  { %v89_v20 = vpack.c.bf16 %v49_v19, %v48_v18  ;;  %v50_v21 = vsel %vm42_vm2, %v38_v12, %v46_v16  ;;  %v51_v22 = vsel %vm43_vm3, %v39_v13, %v47_v17 }
   0xb   :  { %v94_v23 = vpack.c.bf16 %v51_v22, %v50_v21 }
   0xc   :  { %90 = vst [vmem:[%s144_s3] sm:$0xff] %v89_v20  }
   0xd   :  { %96 = vst [vmem:[%s144_s3 + $0x8] sm:$0xff] %v94_v23  }

// kernel: _lambda_.18
= control target key start
LH: loop header
LB: loop body
LE: loop exit
PB: predicated region body
PF: predicated region fallthrough
CT: control target
= control target key end

     0   :  { %s1012_s9 = smov 0   ;;  %s1014_s10 = smov 0   ;;  %s1130_s0 = inlined_call_operand.vmem [shape: bf16[24,1024], index: 0, kind: input, shape index: {}]   ;;  %s1131_s1 = inlined_call_operand.vmem [shape: bf16[1024,128], index: 1, kind: input, shape index: {}]   ;;  %s1132_s2 = inlined_call_operand.vmem [shape: f32[24,128], index: 2, kind: output, shape index: {}]  }
   0x1   :  { %s1016_s11 = smov 0   ;;  %s1018_s12 = smov 0  }
   0x2   :  { %s1020_s13 = smov 0  }
   0x3 LB: > { %s24_s14 = sadd.s32 1, %s990_s12  ;;  %p47_p1 = scmp.ne.s32.totalorder %s982_s10, %s978_s9  ;;  %s994_s13 = sphi %s1020_s13, %s12_s13   ;;  %s990_s12 = sphi %s1018_s12, %s1136_s12   ;;  %s986_s11 = sphi %s1016_s11, %s1135_s11   ;;  %s982_s10 = sphi %s1014_s10, %s1134_s10   ;;  %s978_s9 = sphi %s1012_s9, %s1133_s9  }
   0x4   : > { %p25_p0 = scmp.ge.s32.totalorder %s24_s14, 2  ;;  %p48_p2 = scmp.eq.s32.totalorder %s994_s13, 0 }
   0x5   : > { %s40_s16 = sadd.s32 1, %s982_s10  ;;  %p762_p5 = scmp.ge.s32.totalorder %s994_s13, 2 }
   0x6   : > { %s1138_s14 = smov (%p25_p0, %s24_s14), 0  ;;  %p49_p3 = por %p48_p2, %p47_p1 }
   0x7   : > { %s36_s15 = ssub.s32 %s990_s12, %s1138_s14  ;;  %129 = sbr.rel (%p762_p5) target bundleno = 21 (0x15), region = 16 }
   0x8   : > { %p38_p4 = scmp.eq.s32.totalorder %s36_s15, 0 }
   0xa   : > { %s1047_s17 = scalar_select %p38_p4, %s982_s10, %s40_s16  }
   0xe   : > { %132 = sbr.rel (!%p49_p3) target bundleno = 21 (0x15), region = 20  ;;  %s134_s18 = sand.u32 (%p49_p3), 1, %s982_s10  }
   0xf   : > { %s814_s19 = sshll.u32 (%p49_p3), %s990_s12, 4  ;;  %s871_s20 = smul.u32 (%p49_p3), 48, %s134_s18 }
  0x10   : > { %s142_s23 = scalar_lea.vmem (%p49_p3), %s1130_s0, %s814_s19 }
  0x11   : > { %v155_v0 = vld [vmem:[%s142_s23] sm:$0xff] (%p49_p3)  ;;  %v157_v1 = vld [vmem:[%s142_s23 + $0x8] sm:$0xff] (%p49_p3)  ;;  %s136_s24 = scalar_lea.vmem (%p49_p3), [#allocation3], %s871_s20 }
  0x12   : > { %v159_v2 = vld [vmem:[%s142_s23 + $0x20] sm:$0xff] (%p49_p3)  ;;  %v161_v3 = vld [vmem:[%s142_s23 + $0x28] sm:$0xff] (%p49_p3)  ;;  %156 = vst [vmem:[%s136_s24] sm:$0xff] (%p49_p3), %v155_v0  ;;  %158 = vst [vmem:[%s136_s24 + $0x8] sm:$0xff] (%p49_p3), %v157_v1 }
  0x13   : > { %v163_v4 = vld [vmem:[%s142_s23 + $0x40] sm:$0xff] (%p49_p3)  ;;  %v165_v5 = vld [vmem:[%s142_s23 + $0x48] sm:$0xff] (%p49_p3)  ;;  %160 = vst [vmem:[%s136_s24 + $0x10] sm:$0xff] (%p49_p3), %v159_v2  ;;  %162 = vst [vmem:[%s136_s24 + $0x18] sm:$0xff] (%p49_p3), %v161_v3 }
  0x14   : > { %164 = vst [vmem:[%s136_s24 + $0x20] sm:$0xff] (%p49_p3), %v163_v4  ;;  %166 = vst [vmem:[%s136_s24 + $0x28] sm:$0xff] (%p49_p3), %v165_v5 }
  0x15 PF: > { %p765_p6 = scmp.ge.s32.totalorder %s994_s13, 1  ;;  %p183_p7 = scmp.lt.s32.totalorder %s994_s13, 3 }
  0x17   : > { %p184_p8 = pnand %p765_p6, %p183_p7 }
  0x18   : > { %s190_s25 = sand.u32 (!%p184_p8), 1, %s978_s9   ;;  %s766_s26 = sshll.u32 (!%p184_p8), %s986_s11, 6 }
  0x19   : > { %187 = sbr.rel (%p184_p8) target bundleno = 310 (0x136), region = 47  ;;  %p225_p9 = scmp.lt.s32.totalorder (!%p184_p8), %s766_s26, 127 }
  0x1a   : > { %s872_s27 = smul.u32 (!%p184_p8), 48, %s190_s25  ;;  %p768_p10 = scmp.ne.s32.totalorder (!%p184_p8), %s986_s11, 0 }
  0x1c   : > { %s1064_s4 = scalar_lea.vmem (!%p184_p8), [#allocation3], %s872_s27 }
  0x20   : > { %s1140_s26 = smov (!%p225_p9, %s766_s26), 127  ;;  %246 = sbr.rel (%p768_p10) target bundleno = 39 (0x27), region = 55 }
  0x21   : > { %s767_s28 = sshll.u32 %s1140_s26, 2  ;;  %v996_v6 = vmov (!%p768_p10), 0.0  }
  0x22   : > { %s1062_s3 = scalar_lea.vmem %s1131_s1, %s767_s28  ;;  %247 = vst [vmem:[#allocation2] sm:$0xff] (!%p768_p10), %v996_v6  ;;  %248 = vst [vmem:[#allocation2 + $0x8] sm:$0xff] (!%p768_p10), %v996_v6 }
  0x23   : > { %249 = vst [vmem:[#allocation2 + $0x10] sm:$0xff] (!%p768_p10), %v996_v6 }
  0x27 PF: > { %v914_v7 = vld [vmem:[%s1062_s3 + $0x40] sm:$0xff]   ;;  %v918_v11 = vld [vmem:[%s1062_s3 + $0x48] sm:$0xff]   ;;  %v922_v15 = vld [vmem:[%s1062_s3 + $0x50] sm:$0xff]   ;;  %p809_p11 = scmp.ne.s32.totalorder %s986_s11, 1 }
  0x28   : > { %v915_v8 = vld [vmem:[%s1062_s3 + $0xc0] sm:$0xff]   ;;  %815 = vmatprep.subr.bf16.mxu0 %v914_v7  ;;  %v919_v12 = vld [vmem:[%s1062_s3 + $0xc8] sm:$0xff]   ;;  %v923_v16 = vld [vmem:[%s1062_s3 + $0xd0] sm:$0xff]  }
  0x29   : > { %v916_v9 = vld [vmem:[%s1062_s3] sm:$0xff]   ;;  %843 = vmatprep.subr.bf16.mxu1 %v915_v8  ;;  %v920_v13 = vld [vmem:[%s1062_s3 + $0x8] sm:$0xff]   ;;  %v924_v17 = vld [vmem:[%s1062_s3 + $0x10] sm:$0xff]  }
  0x2a   : > { %v917_v10 = vld [vmem:[%s1062_s3 + $0x80] sm:$0xff]   ;;  %816 = vmatpush3.bf16.msra.mxu0 %v916_v9  ;;  %v921_v14 = vld [vmem:[%s1062_s3 + $0x88] sm:$0xff]   ;;  %v925_v18 = vld [vmem:[%s1062_s3 + $0x90] sm:$0xff]  }
  0x2b   : > { %844 = vmatpush3.bf16.msra.mxu1 %v917_v10  ;;  %817 = vmatprep.subr.bf16.mxu0 %v918_v11  ;;  %v926_v19 = vld [vmem:[%s1062_s3 + $0x58] sm:$0xff]   ;;  %v930_v23 = vld [vmem:[%s1062_s3 + $0x60] sm:$0xff]   ;;  %v934_v27 = vld [vmem:[%s1062_s3 + $0x68] sm:$0xff]  }
  0x2c   : > { %845 = vmatprep.subr.bf16.mxu1 %v919_v12  ;;  %v927_v20 = vld [vmem:[%s1062_s3 + $0xd8] sm:$0xff]   ;;  %v931_v24 = vld [vmem:[%s1062_s3 + $0xe0] sm:$0xff]   ;;  %v935_v28 = vld [vmem:[%s1062_s3 + $0xe8] sm:$0xff]  }
  0x2d   : > { %v928_v21 = vld [vmem:[%s1062_s3 + $0x18] sm:$0xff]   ;;  %v932_v25 = vld [vmem:[%s1062_s3 + $0x20] sm:$0xff]   ;;  %v936_v29 = vld [vmem:[%s1062_s3 + $0x28] sm:$0xff]  }
  0x2e   : > { %818 = vmatpush3.bf16.msra.mxu0 %v920_v13  ;;  %v929_v22 = vld [vmem:[%s1062_s3 + $0x98] sm:$0xff]   ;;  %v933_v26 = vld [vmem:[%s1062_s3 + $0xa0] sm:$0xff]   ;;  %v937_v30 = vld [vmem:[%s1062_s3 + $0xa8] sm:$0xff]  }
  0x2f   : > { %846 = vmatpush3.bf16.msra.mxu1 %v921_v14  ;;  %819 = vmatprep.subr.bf16.mxu0 %v922_v15  ;;  %v938_v31 = vld [vmem:[%s1062_s3 + $0x70] sm:$0xff]   ;;  %v942_v35 = vld [vmem:[%s1062_s3 + $0x78] sm:$0xff]   ;;  %v250_v58 = vld [vmem:[#allocation2] sm:$0xff] }
  0x30   : > { %847 = vmatprep.subr.bf16.mxu1 %v923_v16  ;;  %v939_v32 = vld [vmem:[%s1062_s3 + $0xf0] sm:$0xff]   ;;  %v943_v36 = vld [vmem:[%s1062_s3 + $0xf8] sm:$0xff]   ;;  %v251_v63 = vld [vmem:[#allocation2 + $0x8] sm:$0xff] }
  0x31   : > { %v940_v33 = vld [vmem:[%s1062_s3 + $0x30] sm:$0xff]   ;;  %v944_v37 = vld [vmem:[%s1062_s3 + $0x38] sm:$0xff]  }
  0x32   : > { %820 = vmatpush3.bf16.msra.mxu0 %v924_v17  ;;  %v941_v34 = vld [vmem:[%s1062_s3 + $0xb0] sm:$0xff]   ;;  %v945_v38 = vld [vmem:[%s1062_s3 + $0xb8] sm:$0xff]  }
  0x33   : > { %848 = vmatpush3.bf16.msra.mxu1 %v925_v18  ;;  %821 = vmatprep.subr.bf16.mxu0 %v926_v19  ;;  %v946_v39 = vld [vmem:[%s1064_s4] ss:$16 sps:$4 sm:$0xff]   ;;  %v948_v40 = vld [vmem:[%s1064_s4 + $0x4] ss:$16 sps:$4 sm:$0xff]   ;;  %v949_v41 = vld [vmem:[%s1064_s4 + $0x8] ss:$16 sps:$4 sm:$0xff]  }
  0x34   : > { %849 = vmatprep.subr.bf16.mxu1 %v927_v20  ;;  %v951_v42 = vld [vmem:[%s1064_s4 + $0xc] ss:$16 sps:$4 sm:$0xff]   ;;  %v257_v43 = vld [vmem:[%s1064_s4 + $0x20] sm:$0xff]  ;;  %581 = vmatprep.mubr.bf16.mxu0 %v948_v40 }
  0x35   : > { %v774_v44 = vcombine.high %v257_v43, %v257_v43  ;;  %v258_v45 = vld [vmem:[%s1064_s4 + $0x28] sm:$0xff]  ;;  %629 = vmatprep.mubr.bf16.mxu1 %v951_v42  ;;  %v773_v47 = vcombine.low %v257_v43, %v257_v43 }
  0x36   : > { %822 = vmatpush3.bf16.msra.mxu0 %v928_v21  ;;  %v776_v46 = vcombine.high %v258_v45, %v258_v45  ;;  %v775_v48 = vcombine.low %v258_v45, %v258_v45  ;;  %v252_v12 = vld [vmem:[#allocation2 + $0x10] sm:$0xff] }
  0x37   : > { %850 = vmatpush3.bf16.msra.mxu1 %v929_v22  ;;  %823 = vmatprep.subr.bf16.mxu0 %v930_v23 }
  0x38   : > { %851 = vmatprep.subr.bf16.mxu1 %v931_v24 }
  0x3a   : > { %824 = vmatpush3.bf16.msra.mxu0 %v932_v25 }
  0x3b   : > { %852 = vmatpush3.bf16.msra.mxu1 %v933_v26  ;;  %825 = vmatprep.subr.bf16.mxu0 %v934_v27 }
  0x3c   : > { %853 = vmatprep.subr.bf16.mxu1 %v935_v28 }
  0x3e   : > { %826 = vmatpush3.bf16.msra.mxu0 %v936_v29 }
  0x3f   : > { %854 = vmatpush3.bf16.msra.mxu1 %v937_v30  ;;  %827 = vmatprep.subr.bf16.mxu0 %v938_v31 }
  0x40   : > { %855 = vmatprep.subr.bf16.mxu1 %v939_v32 }
  0x42   : > { %828 = vmatpush3.bf16.msra.mxu0 %v940_v33 }
  0x43   : > { %856 = vmatpush3.bf16.msra.mxu1 %v941_v34  ;;  %829 = vmatprep.subr.bf16.mxu0 %v942_v35 }
  0x44   : > { %857 = vmatprep.subr.bf16.mxu1 %v943_v36 }
  0x46   : > { %830 = vmatpush3.bf16.msra.mxu0 %v944_v37 }
  0x47   : > { %858 = vmatpush3.bf16.msra.mxu1 %v945_v38 }
  0x49   : > { %582 = vmatmul.mubr.bf16.vlgmr.msra.gmra.mrb[0].mxu0 %v946_v39 }
  0x4a   : > { %630 = vmatmul.mubr.bf16.vlgmr.msra.gmra.mrb[0].mxu1 %v949_v41  ;;  %589 = vmatprep.mubr.bf16.mxu0 %v774_v44 }
  0x4b   : > { %637 = vmatprep.mubr.bf16.mxu1 %v776_v46 }
  0x51   : > { %590 = vmatmul.mubr.bf16.gmra.mrb[4].mxu0 %v773_v47 }
  0x52   : > { %638 = vmatmul.mubr.bf16.gmra.mrb[4].mxu1 %v775_v48 }
 0x11c   : > { %v831_v49 = vpop.f32.mrb[0].mxu0 }
 0x11d   : > { %v859_v50 = vpop.f32.mrb[0].mxu1  ;;  %v832_v51 = vpop.f32.mrb[1].mxu0 }
 0x11e   : > { %v833_v52 = vadd.f32 %v832_v51, %v831_v49  ;;  %v860_v53 = vpop.f32.mrb[1].mxu1  ;;  %v834_v54 = vpop.f32.mrb[2].mxu0 }
 0x11f   : > { %v861_v55 = vadd.f32 %v860_v53, %v859_v50  ;;  %v862_v56 = vpop.f32.mrb[2].mxu1  ;;  %v835_v57 = vpop.f32.mrb[3].mxu0 }
 0x120   : > { %v836_v59 = vadd.f32 %v835_v57, %v834_v54  ;;  %v863_v60 = vpop.f32.mrb[3].mxu1 }
 0x121   : > { %v632_v61 = vadd.f32 %v861_v55, %v833_v52  ;;  %v864_v62 = vadd.f32 %v863_v60, %v862_v56 }
 0x123   : > { %v645_v0 = vadd.f32 %v632_v61, %v250_v58  ;;  %v635_v1 = vadd.f32 %v864_v62, %v836_v59 }
 0x124   : > { %v837_v2 = vpop.f32.mrb[4].mxu0 }
 0x125   : > { %648 = vst [vmem:[#allocation2] sm:$0xff] %v645_v0  ;;  %v646_v3 = vadd.f32 %v635_v1, %v251_v63  ;;  %v865_v4 = vpop.f32.mrb[4].mxu1  ;;  %v838_v5 = vpop.f32.mrb[5].mxu0 }
 0x126   : > { %v839_v6 = vadd.f32 %v838_v5, %v837_v2  ;;  %v866_v7 = vpop.f32.mrb[5].mxu1  ;;  %v840_v8 = vpop.f32.mrb[6].mxu0 }
 0x127   : > { %649 = vst [vmem:[#allocation2 + $0x8] sm:$0xff] %v646_v3  ;;  %v867_v9 = vadd.f32 %v866_v7, %v865_v4  ;;  %v868_v10 = vpop.f32.mrb[6].mxu1  ;;  %v841_v11 = vpop.f32.mrb[7].mxu0  ;;  %654 = sbr.rel (%p809_p11) target bundleno = 310 (0x136), region = 59 }
 0x128   : > { %v869_v13 = vpop.f32.mrb[7].mxu1 }
 0x129   : > { %v640_v14 = vadd.f32 %v867_v9, %v839_v6 }
 0x12b   : > { %v647_v15 = vadd.f32 %v640_v14, %v252_v12 }
 0x12c   : > { %v655_v16 = vld [vmem:[#allocation2] sm:$0xff] (!%p809_p11) }
 0x12d   : > { %650 = vst [vmem:[#allocation2 + $0x10] sm:$0xff] %v647_v15  ;;  %658 = vst [vmem:[%s1132_s2] sm:$0xff] (!%p809_p11), %v655_v16 }
 0x12e   : > { %v656_v17 = vld [vmem:[#allocation2 + $0x8] sm:$0xff] }
 0x12f   : > { %659 = vst [vmem:[%s1132_s2 + $0x8] sm:$0xff] %v656_v17 }
 0x134   : > { %v657_v18 = vld [vmem:[#allocation2 + $0x10] sm:$0xff] }
 0x135   : > { %660 = vst [vmem:[%s1132_s2 + $0x10] sm:$0xff] %v657_v18 }
 0x136 PF: > { %s12_s13 = sadd.s32 1, %s994_s13   ;;  %s1133_s9 = smov %s982_s10 }
 0x137   : > { %p9_p12 = scmp.ge.s32.totalorder %s12_s13, 4   ;;  %s1134_s10 = smov %s1047_s17 }
 0x138   : > { %s1135_s11 = smov %s990_s12  ;;  %s1136_s12 = smov %s1138_s14 }
 0x139   :  { %11 = sbr.rel (!%p9_p12) target bundleno = 3 (0x3), region = 97 }

// kernel: _lambda_.19
= control target key start
LH: loop header
LB: loop body
LE: loop exit
PB: predicated region body
PF: predicated region fallthrough
CT: control target
= control target key end

     0   :  { %v60_v0 = vmov 0.0   ;;  %s91_s0 = inlined_call_operand.vmem [shape: f32[24,128], index: 0, kind: input, shape index: {}]   ;;  %s92_s1 = inlined_call_operand.vmem [shape: f32[1,128], index: 1, kind: output, shape index: {0}]   ;;  %s93_s2 = inlined_call_operand.vmem [shape: f32[1,128], index: 2, kind: output, shape index: {1}]  }
   0x1   :  { %14 = vst [vmem:[#allocation2] sm:$0x1] %v60_v0  ;;  %15 = vst [vmem:[#allocation3] sm:$0x1] %v60_v0  ;;  %v16_v1 = vld [vmem:[%s91_s0] sm:$0xff]  ;;  %v17_v2 = vld [vmem:[%s91_s0 + $0x8] sm:$0xff] }
   0x2   :  { %v18_v3 = vld [vmem:[%s91_s0 + $0x10] sm:$0xff]  ;;  %v20_v4 = vadd.f32 %v17_v2, %v16_v1  ;;  %v31_v5 = vmul.f32 %v16_v1, %v16_v1  ;;  %v32_v6 = vmul.f32 %v17_v2, %v17_v2 }
   0x3   :  { %v33_v7 = vmul.f32 %v18_v3, %v18_v3 }
   0x4   :  { %v21_v8 = vadd.f32 %v20_v4, %v18_v3  ;;  %v34_v9 = vadd.f32 %v32_v6, %v31_v5 }
   0x6   :  { %v22_v10 = vrot.slane %v21_v8, 4  ;;  %v35_v11 = vadd.f32 %v34_v9, %v33_v7 }
   0x8   :  { %v23_v12 = vadd.f32 %v22_v10, %v21_v8  ;;  %v36_v13 = vrot.slane %v35_v11, 4  ;;  %v19_v20 = vld [vmem:[#allocation2] sm:$0x1]  ;;  %v30_v23 = vld [vmem:[#allocation3] sm:$0x1] }
   0xa   :  { %v24_v14 = vrot.slane %v23_v12, 2  ;;  %v37_v15 = vadd.f32 %v36_v13, %v35_v11 }
   0xc   :  { %v25_v16 = vadd.f32 %v24_v14, %v23_v12  ;;  %v38_v17 = vrot.slane %v37_v15, 2 }
   0xe   :  { %v26_v18 = vrot.slane %v25_v16, 1  ;;  %v39_v19 = vadd.f32 %v38_v17, %v37_v15 }
  0x10   :  { %v27_v21 = vadd.f32 %v26_v18, %v25_v16  ;;  %v40_v22 = vrot.slane %v39_v19, 1 }
  0x12   :  { %v28_v24 = vadd.f32 %v27_v21, %v19_v20  ;;  %v41_v25 = vadd.f32 %v40_v22, %v39_v19 }
  0x14   :  { %29 = vst [vmem:[#allocation2] sm:$0x1] %v28_v24  ;;  %v42_v26 = vadd.f32 %v41_v25, %v30_v23 }
  0x16   :  { %43 = vst [vmem:[#allocation3] sm:$0x1] %v42_v26 }
  0x1b   :  { %v47_v27 = vld [vmem:[#allocation2] sm:$0x1] }
  0x1c   :  { %48 = vst [vmem:[%s92_s1] sm:$0x1] %v47_v27 }
  0x1d   :  { %v49_v28 = vld [vmem:[#allocation3] sm:$0x1] }
  0x1e   :  { %50 = vst [vmem:[%s93_s2] sm:$0x1] %v49_v28 }

// kernel: _lambda_.20
= control target key start
LH: loop header
LB: loop body
LE: loop exit
PB: predicated region body
PF: predicated region fallthrough
CT: control target
= control target key end

     0   :  { %s120_s0 = inlined_call_operand.vmem [shape: f32[24,128], index: 0, kind: input, shape index: {}]   ;;  %s121_s1 = inlined_call_operand.vmem [shape: f32[1,128], index: 1, kind: input, shape index: {}]   ;;  %s122_s2 = inlined_call_operand.vmem [shape: f32[1,128], index: 2, kind: input, shape index: {}]   ;;  %s123_s3 = inlined_call_operand.vmem [shape: bf16[24,128], index: 3, kind: output, shape index: {}]  }
   0x1   :  { %v14_v0 = vld [vmem:[%s120_s0] sm:$0xff]  ;;  %v15_v1 = vld [vmem:[%s120_s0 + $0x8] sm:$0xff]  ;;  %v16_v6 = vld [vmem:[%s120_s0 + $0x10] sm:$0xff] }
   0x2   :  { %v66_v2 = vld [vmem:[%s121_s1] ss:$0 sm:$0xff] }
   0x3   :  { %v24_v3 = vmul.f32 %v66_v2, %v14_v0  ;;  %v25_v4 = vmul.f32 %v66_v2, %v15_v1  ;;  %v67_v5 = vld [vmem:[%s122_s2] ss:$0 sm:$0xff]  ;;  %v26_v7 = vmul.f32 %v66_v2, %v16_v6 }
   0x5   :  { %v34_v8 = vadd.f32 %v67_v5, %v24_v3  ;;  %v35_v9 = vadd.f32 %v67_v5, %v25_v4  ;;  %v36_v10 = vadd.f32 %v67_v5, %v26_v7 }
   0x7   :  { %vm37_vm0 = vcmp.gt.f32.partialorder %v34_v8, 0.0  ;;  %vm38_vm1 = vcmp.gt.f32.partialorder %v35_v9, 0.0  ;;  %v40_v11 = vmul.f32 0.2, %v34_v8  ;;  %v41_v12 = vmul.f32 0.2, %v35_v9 }
   0x8   :  { %vm39_vm2 = vcmp.gt.f32.partialorder %v36_v10, 0.0  ;;  %v42_v13 = vmul.f32 0.2, %v36_v10 }
   0x9   :  { %v43_v14 = vsel %vm37_vm0, %v34_v8, %v40_v11  ;;  %v44_v15 = vsel %vm38_vm1, %v35_v9, %v41_v12 }
   0xa   :  { %v77_v16 = vpack.c.bf16 %v44_v15, %v43_v14  ;;  %v45_v17 = vsel %vm39_vm2, %v36_v10, %v42_v13 }
   0xb   :  { %v73_v18 = vpack.c.bf16 %v45_v17, %v45_v17 }
   0xc   :  { %78 = vst [vmem:[%s123_s3] sm:$0xff] %v77_v16  }
   0xd   :  { %61 = vst [vmem:[%s123_s3 + $0x8] sm:$0xf] %v73_v18 }

// kernel: _lambda_.21
= control target key start
LH: loop header
LB: loop body
LE: loop exit
PB: predicated region body
PF: predicated region fallthrough
CT: control target
= control target key end

     0   :  { %s940_s12 = smov 0   ;;  %s942_s13 = smov 0   ;;  %s1023_s0 = inlined_call_operand.vmem [shape: bf16[8,1024], index: 0, kind: input, shape index: {}]   ;;  %s1024_s1 = inlined_call_operand.vmem [shape: bf16[1024,128], index: 1, kind: input, shape index: {}]   ;;  %s1025_s2 = inlined_call_operand.vmem [shape: f32[1,128], index: 2, kind: input, shape index: {}]   ;;  %s1026_s3 = inlined_call_operand.vmem [shape: f32[8,128], index: 3, kind: output, shape index: {}]  }
   0x1   :  { %s944_s14 = smov 0  }
   0x2 LB: > { %s25_s15 = sadd.s32 1, %s913_s13  ;;  %p743_p0 = scmp.ge.s32.totalorder %s917_s14, 1  ;;  %s917_s14 = sphi %s944_s14, %s13_s14   ;;  %s913_s13 = sphi %s942_s13, %s1028_s13   ;;  %s909_s12 = sphi %s940_s12, %s1027_s12  }
   0x3   : > { %p26_p1 = scmp.ge.s32.totalorder %s25_s15, 2  ;;  %p189_p2 = scmp.lt.s32.totalorder %s917_s14, 3 }
   0x5   : > { %s1030_s15 = smov (%p26_p1, %s25_s15), 0  ;;  %p190_p3 = pnand %p743_p0, %p189_p2 }
   0x6   : > { %s744_s16 = sshll.u32 (!%p190_p3), %s909_s12, 2  ;;  %s746_s17 = sshll.u32 (!%p190_p3), %s909_s12, 6 }
   0x7   : > { %193 = sbr.rel (%p190_p3) target bundleno = 289 (0x121), region = 32  ;;  %p233_p4 = scmp.lt.s32.totalorder (!%p190_p3), %s744_s16, 7 }
   0x8   : > { %p241_p5 = scmp.lt.s32.totalorder (!%p190_p3), %s746_s17, 127  ;;  %p748_p6 = scmp.ne.s32.totalorder (!%p190_p3), %s909_s12, 0 }
   0xe   : > { %s1032_s16 = smov (!%p233_p4, %s744_s16), 7  ;;  %s1034_s17 = smov (!%p241_p5, %s746_s17), 127 }
   0xf   : > { %s745_s18 = sshll.u32 %s1032_s16, 2  ;;  %s747_s22 = sshll.u32 %s1034_s17, 2  ;;  %v919_v0 = vmov (!%p748_p6), 0.0  }
  0x10   : > { %s965_s21 = scalar_lea.vmem %s1023_s0, %s745_s18  ;;  %s970_s25 = scalar_lea.vmem %s1024_s1, %s747_s22  ;;  %264 = vst [vmem:[#allocation2] sm:$0xff] (!%p748_p6), %v919_v0 }
  0x11   : > { %263 = sbr.rel (%p748_p6) target bundleno = 24 (0x18), region = 36 }
  0x18 PF: > { %v859_v1 = vld [vmem:[%s970_s25 + $0x40] sm:$0xff]   ;;  %v863_v5 = vld [vmem:[%s970_s25 + $0x48] sm:$0xff]   ;;  %v867_v9 = vld [vmem:[%s970_s25 + $0x50] sm:$0xff]   ;;  %p785_p7 = scmp.ne.s32.totalorder %s909_s12, 1 }
  0x19   : > { %v860_v2 = vld [vmem:[%s970_s25 + $0xc0] sm:$0xff]   ;;  %790 = vmatprep.subr.bf16.mxu0 %v859_v1  ;;  %v864_v6 = vld [vmem:[%s970_s25 + $0xc8] sm:$0xff]   ;;  %v868_v10 = vld [vmem:[%s970_s25 + $0xd0] sm:$0xff]  }
  0x1a   : > { %v861_v3 = vld [vmem:[%s970_s25] sm:$0xff]   ;;  %812 = vmatprep.subr.bf16.mxu1 %v860_v2  ;;  %v865_v7 = vld [vmem:[%s970_s25 + $0x8] sm:$0xff]   ;;  %v869_v11 = vld [vmem:[%s970_s25 + $0x10] sm:$0xff]  }
  0x1b   : > { %v862_v4 = vld [vmem:[%s970_s25 + $0x80] sm:$0xff]   ;;  %791 = vmatpush3.bf16.msra.mxu0 %v861_v3  ;;  %v866_v8 = vld [vmem:[%s970_s25 + $0x88] sm:$0xff]   ;;  %v870_v12 = vld [vmem:[%s970_s25 + $0x90] sm:$0xff]  }
  0x1c   : > { %813 = vmatpush3.bf16.msra.mxu1 %v862_v4  ;;  %792 = vmatprep.subr.bf16.mxu0 %v863_v5  ;;  %v871_v13 = vld [vmem:[%s970_s25 + $0x58] sm:$0xff]   ;;  %v875_v17 = vld [vmem:[%s970_s25 + $0x60] sm:$0xff]   ;;  %v879_v21 = vld [vmem:[%s970_s25 + $0x68] sm:$0xff]  }
  0x1d   : > { %814 = vmatprep.subr.bf16.mxu1 %v864_v6  ;;  %v872_v14 = vld [vmem:[%s970_s25 + $0xd8] sm:$0xff]   ;;  %v876_v18 = vld [vmem:[%s970_s25 + $0xe0] sm:$0xff]   ;;  %v880_v22 = vld [vmem:[%s970_s25 + $0xe8] sm:$0xff]  }
  0x1e   : > { %v873_v15 = vld [vmem:[%s970_s25 + $0x18] sm:$0xff]   ;;  %v877_v19 = vld [vmem:[%s970_s25 + $0x20] sm:$0xff]   ;;  %v881_v23 = vld [vmem:[%s970_s25 + $0x28] sm:$0xff]  }
  0x1f   : > { %793 = vmatpush3.bf16.msra.mxu0 %v865_v7  ;;  %v874_v16 = vld [vmem:[%s970_s25 + $0x98] sm:$0xff]   ;;  %v878_v20 = vld [vmem:[%s970_s25 + $0xa0] sm:$0xff]   ;;  %v882_v24 = vld [vmem:[%s970_s25 + $0xa8] sm:$0xff]  }
  0x20   : > { %815 = vmatpush3.bf16.msra.mxu1 %v866_v8  ;;  %794 = vmatprep.subr.bf16.mxu0 %v867_v9  ;;  %v883_v25 = vld [vmem:[%s970_s25 + $0x70] sm:$0xff]   ;;  %v887_v29 = vld [vmem:[%s970_s25 + $0x78] sm:$0xff]   ;;  %v266_v33 = vld [vmem:[%s965_s21] sm:$0xff] }
  0x21   : > { %816 = vmatprep.subr.bf16.mxu1 %v868_v10  ;;  %v884_v26 = vld [vmem:[%s970_s25 + $0xf0] sm:$0xff]   ;;  %v888_v30 = vld [vmem:[%s970_s25 + $0xf8] sm:$0xff]   ;;  %v267_v34 = vld [vmem:[%s965_s21 + $0x8] sm:$0xff]  ;;  %v749_v35 = vcombine.low %v266_v33, %v266_v33  ;;  %v750_v36 = vcombine.high %v266_v33, %v266_v33 }
  0x22   : > { %v885_v27 = vld [vmem:[%s970_s25 + $0x30] sm:$0xff]   ;;  %v889_v31 = vld [vmem:[%s970_s25 + $0x38] sm:$0xff]   ;;  %v751_v37 = vcombine.low %v267_v34, %v267_v34  ;;  %v752_v38 = vcombine.high %v267_v34, %v267_v34  ;;  %v265_v47 = vld [vmem:[#allocation2] sm:$0xff] }
  0x23   : > { %795 = vmatpush3.bf16.msra.mxu0 %v869_v11  ;;  %v886_v28 = vld [vmem:[%s970_s25 + $0xb0] sm:$0xff]   ;;  %v890_v32 = vld [vmem:[%s970_s25 + $0xb8] sm:$0xff]   ;;  %570 = vmatprep.mubr.bf16.mxu0 %v750_v36  ;;  %v786_v53 = vld [vmem:[%s1025_s2] ss:$0 sm:$0xff] (!%p785_p7) }
  0x24   : > { %817 = vmatpush3.bf16.msra.mxu1 %v870_v12  ;;  %796 = vmatprep.subr.bf16.mxu0 %v871_v13 }
  0x25   : > { %818 = vmatprep.subr.bf16.mxu1 %v872_v14  ;;  %610 = vmatprep.mubr.bf16.mxu1 %v752_v38 }
  0x27   : > { %797 = vmatpush3.bf16.msra.mxu0 %v873_v15 }
  0x28   : > { %819 = vmatpush3.bf16.msra.mxu1 %v874_v16  ;;  %798 = vmatprep.subr.bf16.mxu0 %v875_v17 }
  0x29   : > { %820 = vmatprep.subr.bf16.mxu1 %v876_v18 }
  0x2b   : > { %799 = vmatpush3.bf16.msra.mxu0 %v877_v19 }
  0x2c   : > { %821 = vmatpush3.bf16.msra.mxu1 %v878_v20  ;;  %800 = vmatprep.subr.bf16.mxu0 %v879_v21 }
  0x2d   : > { %822 = vmatprep.subr.bf16.mxu1 %v880_v22 }
  0x2f   : > { %801 = vmatpush3.bf16.msra.mxu0 %v881_v23 }
  0x30   : > { %823 = vmatpush3.bf16.msra.mxu1 %v882_v24  ;;  %802 = vmatprep.subr.bf16.mxu0 %v883_v25 }
  0x31   : > { %824 = vmatprep.subr.bf16.mxu1 %v884_v26 }
  0x33   : > { %803 = vmatpush3.bf16.msra.mxu0 %v885_v27 }
  0x34   : > { %825 = vmatpush3.bf16.msra.mxu1 %v886_v28  ;;  %804 = vmatprep.subr.bf16.mxu0 %v887_v29 }
  0x35   : > { %826 = vmatprep.subr.bf16.mxu1 %v888_v30 }
  0x37   : > { %805 = vmatpush3.bf16.msra.mxu0 %v889_v31 }
  0x38   : > { %827 = vmatpush3.bf16.msra.mxu1 %v890_v32 }
  0x3a   : > { %571 = vmatmul.mubr.bf16.vlgmr.msra.gmra.mrb[0].mxu0 %v749_v35 }
  0x3b   : > { %611 = vmatmul.mubr.bf16.vlgmr.msra.gmra.mrb[0].mxu1 %v751_v37 }
 0x10d   : > { %v806_v39 = vpop.f32.mrb[0].mxu0 }
 0x10e   : > { %v828_v40 = vpop.f32.mrb[0].mxu1  ;;  %v807_v41 = vpop.f32.mrb[1].mxu0 }
 0x10f   : > { %v829_v42 = vpop.f32.mrb[1].mxu1  ;;  %v808_v43 = vadd.f32 %v807_v41, %v806_v39  ;;  %v809_v45 = vpop.f32.mrb[2].mxu0 }
 0x110   : > { %v830_v44 = vadd.f32 %v829_v42, %v828_v40  ;;  %v831_v46 = vpop.f32.mrb[2].mxu1  ;;  %v810_v48 = vpop.f32.mrb[3].mxu0  ;;  %623 = sbr.rel (%p785_p7) target bundleno = 289 (0x121), region = 40 }
 0x111   : > { %v832_v49 = vpop.f32.mrb[3].mxu1 }
 0x112   : > { %v613_v50 = vadd.f32 %v830_v44, %v808_v43 }
 0x114   : > { %v618_v51 = vadd.f32 %v613_v50, %v265_v47 }
 0x116   : > { %619 = vst [vmem:[#allocation2] sm:$0xff] %v618_v51 }
 0x11d   : > { %v624_v52 = vld [vmem:[#allocation2] sm:$0xff] }
 0x11e   : > { %v632_v54 = vadd.f32 %v786_v53, %v624_v52 }
 0x120   : > { %633 = vst [vmem:[%s1026_s3] sm:$0xff] %v632_v54 }
 0x121 PF: > { %s13_s14 = sadd.s32 1, %s917_s14   ;;  %s1027_s12 = smov %s913_s13 }
 0x122   : > { %p10_p8 = scmp.ge.s32.totalorder %s13_s14, 4   ;;  %s1028_s13 = smov %s1030_s15 }
 0x124   :  { %12 = sbr.rel (!%p10_p8) target bundleno = 2 (0x2), region = 76 }

</bundles_post_ra>
